<compile_context>
chip_gen: v6e
topology: v6e:2x2x1
jax: 0.10.0
libtpu: 0.0.40
codegen_flags: <defaults>
</compile_context>

<pallas_src>
import functools

import jax
import jax.numpy as jnp
from jax.experimental import pallas as pl
from jax.experimental.pallas import tpu as pltpu


# ----------------------------- Pallas kernel --------------------------------

def _fused_conv_kernel(*refs, do_norm, act, eps, has_bias, has_affine, has_res):
    """out[Cout, L] = act( norm( W @ colsT [+ bias] ) [*g + b] [+ res] )."""
    i = 0
    colsT_ref = refs[i]; i += 1          # [Kp, L]    bf16
    w_ref = refs[i]; i += 1              # [Cout, Kp] bf16
    bias_ref = gamma_ref = beta_ref = res_ref = None
    if has_bias:
        bias_ref = refs[i]; i += 1       # [Cout, 1] f32
    if has_affine:
        gamma_ref = refs[i]; beta_ref = refs[i + 1]; i += 2   # [Cout, 1] f32
    if has_res:
        res_ref = refs[i]; i += 1        # [Cout, L] f32
    o_ref = refs[i]                      # [Cout, L] f32

    y = jnp.dot(w_ref[...], colsT_ref[...],
                preferred_element_type=jnp.float32)            # MXU, f32 acc
    if has_bias:
        y = y + bias_ref[...]
    if do_norm:
        # Per-row (channel / (n,channel)) stats over the lane axis.
        mean = jnp.mean(y, axis=-1, keepdims=True)
        var = jnp.mean(jnp.square(y - mean), axis=-1, keepdims=True)
        y = (y - mean) * jax.lax.rsqrt(var + eps)
        if has_affine:
            y = y * gamma_ref[...] + beta_ref[...]
    if has_res:
        y = y + res_ref[...]
    if act == "relu":
        y = jnp.maximum(y, 0.0)
    elif act == "tanh":
        y = jnp.tanh(y)
    o_ref[...] = y


def _round_up(x, m):
    return ((x + m - 1) // m) * m


def fused_layer(colsT, w_mat, bias=None, gamma=None, beta=None, res=None,
                do_norm=False, act="none", eps=1e-5):
    """colsT: [G, K, L], w_mat: [Cout, K]  ->  out: [G, Cout, L] (f32).

    G is the 'stats group' / grid axis: G=N (per-sample) for InstanceNorm or
    no-norm layers, G=1 (whole batch in one block) for BatchNorm layers.
    """
    G, K, L = colsT.shape
    cout = w_mat.shape[0]
    Kp = _round_up(K, 16)                                  # bf16 sublane align

    colsT_p = colsT.astype(jnp.bfloat16)
    w_p = w_mat.astype(jnp.bfloat16)
    if Kp != K:
        colsT_p = jnp.pad(colsT_p, ((0, 0), (0, Kp - K), (0, 0)))
        w_p = jnp.pad(w_p, ((0, 0), (0, Kp - K)))

    has_bias = bias is not None
    has_affine = gamma is not None
    has_res = res is not None

    inputs = [colsT_p, w_p]
    in_specs = [
        pl.BlockSpec((None, Kp, L), lambda g: (g, 0, 0)),
        pl.BlockSpec((cout, Kp), lambda g: (0, 0)),
    ]
    if has_bias:
        inputs.append(jnp.asarray(bias, jnp.float32).reshape(cout, 1))
        in_specs.append(pl.BlockSpec((cout, 1), lambda g: (0, 0)))
    if has_affine:
        inputs.append(jnp.asarray(gamma, jnp.float32).reshape(cout, 1))
        in_specs.append(pl.BlockSpec((cout, 1), lambda g: (0, 0)))
        inputs.append(jnp.asarray(beta, jnp.float32).reshape(cout, 1))
        in_specs.append(pl.BlockSpec((cout, 1), lambda g: (0, 0)))
    if has_res:
        inputs.append(res.astype(jnp.float32))
        in_specs.append(pl.BlockSpec((None, cout, L), lambda g: (g, 0, 0)))

    kernel = functools.partial(
        _fused_conv_kernel, do_norm=do_norm, act=act, eps=eps,
        has_bias=has_bias, has_affine=has_affine, has_res=has_res)

    return pl.pallas_call(
        kernel,
        out_shape=jax.ShapeDtypeStruct((G, cout, L), jnp.float32),
        grid=(G,),
        in_specs=in_specs,
        out_specs=pl.BlockSpec((None, cout, L), lambda g: (g, 0, 0)),
        compiler_params=pltpu.CompilerParams(
            dimension_semantics=("parallel",)),
        cost_estimate=pl.CostEstimate(
            flops=int(2 * G * cout * Kp * L),
            transcendentals=int(G * cout * L) if act == "tanh" else 0,
            bytes_accessed=int(2 * colsT_p.size + 2 * w_p.size
                               + 4 * G * cout * L)),
    )(*inputs)


# ------------------------------ glue (JAX) -----------------------------------

def conv_block(x, w, b=None, stride=1, norm=None, act="none",
               gamma=None, beta=None, res=None):
    """x: NCHW.  w: PyTorch Conv2d layout [Cout, Cin, KH, KW].  Fused layer:
    conv + (bias) + (instance/batch norm) + (affine) + (residual) + act."""
    cout, cin, kh, kw = w.shape
    N, C, H, W = x.shape
    oh = (H - kh) // stride + 1
    ow = (W - kw) // stride + 1

    if norm is not None:
        # Conv bias is removed exactly by the norm's mean subtraction -> skip
        # the dead DMA + add.
        b = None

    # Patch extraction (im2col) -> rows ordered (c, i, j) to match
    # w.reshape(Cout, Cin*KH*KW).
    pats = [x[:, :, i:i + stride * (oh - 1) + 1:stride,
                    j:j + stride * (ow - 1) + 1:stride]
            for i in range(kh) for j in range(kw)]
    p = jnp.stack(pats, axis=2)                       # [N, C, kh*kw, oh, ow]
    w_mat = w.reshape(cout, cin * kh * kw)

    if norm == "batch":
        # Stats over (N, H, W): one block, columns ordered (n, oy, ox).
        colsT = p.transpose(1, 2, 0, 3, 4).reshape(1, cin * kh * kw, N * oh * ow)
        res_f = (res.transpose(1, 0, 2, 3).reshape(1, cout, N * oh * ow)
                 if res is not None else None)
        out = fused_layer(colsT, w_mat, bias=b, gamma=gamma, beta=beta,
                          res=res_f, do_norm=True, act=act)
        return out.reshape(cout, N, oh, ow).transpose(1, 0, 2, 3)
    else:
        # InstanceNorm (per-sample stats) or no norm: grid over batch.
        colsT = p.reshape(N, cin * kh * kw, oh * ow)
        out = fused_layer(colsT, w_mat, bias=b,
                          do_norm=(norm == "instance"), act=act)
        return out.reshape(N, cout, oh, ow)


def conv_transpose_block(x, w, stride, norm=None, act="none"):
    """x: NCHW.  w: PyTorch ConvTranspose2d layout [Cin, Cout, KH, KW],
    padding=0, bias=False.  Lowered as dilate + pad + conv(flipped kernel)."""
    N, C, H, W = x.shape
    cin, cout, kh, kw = w.shape
    if stride == 1:
        xd = x
    else:
        hd, wd = (H - 1) * stride + 1, (W - 1) * stride + 1
        xd = jnp.zeros((N, C, hd, wd), x.dtype).at[:, :, ::stride, ::stride].set(x)
    xp = jnp.pad(xd, ((0, 0), (0, 0), (kh - 1, kh - 1), (kw - 1, kw - 1)))
    w_eq = w[:, :, ::-1, ::-1].transpose(1, 0, 2, 3)   # [Cout, Cin, KH, KW]
    return conv_block(xp, w_eq, b=None, stride=1, norm=norm, act=act)


def resnet_block(x, p):
    h = jnp.pad(x, ((0, 0), (0, 0), (1, 1), (1, 1)), mode="reflect")
    h = conv_block(h, p["w1"], None, 1, norm="batch", act="relu",
                   gamma=p["g1"], beta=p["b1"])
    h = jnp.pad(h, ((0, 0), (0, 0), (1, 1), (1, 1)), mode="reflect")
    return conv_block(h, p["w2"], None, 1, norm="batch", act="none",
                      gamma=p["g2"], beta=p["b2"], res=x)


def generator_forward(x_nchw, params):
    x = x_nchw.astype(jnp.float32)
    # encoder: Conv+IN+ReLU  x3
    x = conv_block(x, params["e1_w"], params["e1_b"], 1, norm="instance", act="relu")
    x = conv_block(x, params["e2_w"], params["e2_b"], 2, norm="instance", act="relu")
    x = conv_block(x, params["e3_w"], params["e3_b"], 2, norm="instance", act="relu")
    # bottleneck: 4x ResnetBlock(32)
    for p in params["res"]:
        x = resnet_block(x, p)
    # decoder (target='Auto'): ConvT+IN+ReLU x2, ConvT + Tanh
    x = conv_transpose_block(x, params["d1_w"], 2, norm="instance", act="relu")
    x = conv_transpose_block(x, params["d2_w"], 2, norm="instance", act="relu")
    x = conv_transpose_block(x, params["d3_w"], 1, norm=None, act="tanh")
    return x                                            # NCHW


def init_params(key, gen_input_nc, image_nc):
    ks = iter(jax.random.split(key, 32))

    def conv_w(shape):   # PyTorch Conv2d layout [Cout, Cin, KH, KW]
        fan_in = shape[1] * shape[2] * shape[3]
        return jax.random.normal(next(ks), shape, jnp.float32) / jnp.sqrt(fan_in)

    def convT_w(shape):  # PyTorch ConvTranspose2d layout [Cin, Cout, KH, KW]
        fan_in = shape[0] * shape[2] * shape[3]
        return jax.random.normal(next(ks), shape, jnp.float32) / jnp.sqrt(fan_in)

    def bias(c):
        return 0.1 * jax.random.normal(next(ks), (c,), jnp.float32)

    params = {
        "e1_w": conv_w((8, gen_input_nc, 3, 3)), "e1_b": bias(8),
        "e2_w": conv_w((16, 8, 3, 3)),           "e2_b": bias(16),
        "e3_w": conv_w((32, 16, 3, 3)),          "e3_b": bias(32),
        "d1_w": convT_w((32, 16, 3, 3)),
        "d2_w": convT_w((16, 8, 3, 3)),
        "d3_w": convT_w((8, image_nc, 6, 6)),
        "res": [],
    }
    for _ in range(4):
        params["res"].append({
            "w1": conv_w((32, 32, 3, 3)),
            "g1": jnp.ones((32,), jnp.float32), "b1": jnp.zeros((32,), jnp.float32),
            "w2": conv_w((32, 32, 3, 3)),
            "g2": jnp.ones((32,), jnp.float32), "b2": jnp.zeros((32,), jnp.float32),
        })
    return params


if __name__ == "__main__":
    key = jax.random.PRNGKey(0)
    pkey, xkey = jax.random.split(key)
    gen_input_nc, image_nc = 3, 3
    params = init_params(pkey, gen_input_nc, image_nc)
    x = jax.random.normal(xkey, (2, gen_input_nc, 16, 16), jnp.float32)

    fwd = jax.jit(generator_forward)
    out = jax.block_until_ready(fwd(x, params))

    assert out.shape == (2, image_nc, 16, 16), out.shape
    assert bool(jnp.all(jnp.isfinite(out))), "non-finite output"
    assert bool(jnp.all(jnp.abs(out) <= 1.0 + 1e-6)), "tanh range violated"
    print("KERNEL_OK")
</pallas_src>

<mosaic_0001>
module attributes {stable_mosaic.version = 11 : i64} {
  func.func @_fused_conv_kernel(%arg0: i32, %arg1: memref<1x32x196xbf16, #tpu.memory_space<vmem>>, %arg2: memref<8x32xbf16, #tpu.memory_space<vmem>>, %arg3: memref<1x8x196xf32, #tpu.memory_space<vmem>>) attributes {dimension_semantics = [#tpu.dimension_semantics<parallel>], iteration_bounds = array<i64: 2>, scalar_prefetch = 0 : i64, scratch_operands = 0 : i64, tpu.core_type = #tpu.core_type<tc>, window_params = [{transform_indices = @transform_0, window_bounds = array<i64: 1, 32, 196>}, {pipeline_mode = #tpu.pipeline_mode<synchronous>, transform_indices = @transform_1, window_bounds = array<i64: 8, 32>}, {transform_indices = @transform_2, window_bounds = array<i64: 1, 8, 196>}]} {
    %c0 = arith.constant 0 : index
    %c0_0 = arith.constant 0 : index
    %0 = vector.load %arg2[%c0, %c0_0] : memref<8x32xbf16, #tpu.memory_space<vmem>>, vector<8x32xbf16>
    %c0_1 = arith.constant 0 : index
    %c0_2 = arith.constant 0 : index
    %c0_3 = arith.constant 0 : index
    %1 = vector.load %arg1[%c0_1, %c0_2, %c0_3] : memref<1x32x196xbf16, #tpu.memory_space<vmem>>, vector<1x32x196xbf16>
    %2 = vector.shape_cast %1 : vector<1x32x196xbf16> to vector<32x196xbf16>
    %cst = arith.constant dense<0.000000e+00> : vector<8x196xf32>
    %3 = tpu.matmul %0, %2, %cst {dimension_numbers = #tpu.dot_dimension_numbers<[1], [0], [0], [1], [0, 0, 1, 1], [], []>} : vector<8x32xbf16>, vector<32x196xbf16>, vector<8x196xf32> -> vector<8x196xf32>
    %cst_4 = arith.constant dense<0.000000e+00> : vector<8xf32>
    %4 = vector.multi_reduction <add>, %3, %cst_4 [1] : vector<8x196xf32> to vector<8xf32>
    %5 = vector.shape_cast %4 : vector<8xf32> to vector<8x1xf32>
    %cst_5 = arith.constant 1.960000e+02 : f32
    %6 = vector.broadcast %cst_5 : f32 to vector<8x1xf32>
    %7 = arith.divf %5, %6 : vector<8x1xf32>
    %8 = vector.broadcast %7 : vector<8x1xf32> to vector<8x196xf32>
    %9 = arith.subf %3, %8 : vector<8x196xf32>
    %10 = arith.mulf %9, %9 : vector<8x196xf32>
    %cst_6 = arith.constant dense<0.000000e+00> : vector<8xf32>
    %11 = vector.multi_reduction <add>, %10, %cst_6 [1] : vector<8x196xf32> to vector<8xf32>
    %12 = vector.shape_cast %11 : vector<8xf32> to vector<8x1xf32>
    %cst_7 = arith.constant 1.960000e+02 : f32
    %13 = vector.broadcast %cst_7 : f32 to vector<8x1xf32>
    %14 = arith.divf %12, %13 : vector<8x1xf32>
    %15 = vector.broadcast %7 : vector<8x1xf32> to vector<8x196xf32>
    %16 = arith.subf %3, %15 : vector<8x196xf32>
    %cst_8 = arith.constant 9.99999974E-6 : f32
    %17 = vector.broadcast %cst_8 : f32 to vector<8x1xf32>
    %18 = arith.addf %14, %17 : vector<8x1xf32>
    %19 = math.rsqrt %18 : vector<8x1xf32>
    %20 = vector.broadcast %19 : vector<8x1xf32> to vector<8x196xf32>
    %21 = arith.mulf %16, %20 : vector<8x196xf32>
    %cst_9 = arith.constant 0.000000e+00 : f32
    %22 = vector.broadcast %cst_9 : f32 to vector<8x196xf32>
    %23 = arith.maximumf %21, %22 : vector<8x196xf32>
    %c0_10 = arith.constant 0 : index
    %c0_11 = arith.constant 0 : index
    %c0_12 = arith.constant 0 : index
    %24 = vector.load %arg3[%c0_10, %c0_11, %c0_12] : memref<1x8x196xf32, #tpu.memory_space<vmem>>, vector<1x8x196xf32>
    %25 = vector.shape_cast %24 : vector<1x8x196xf32> to vector<8x196xf32>
    %26 = vector.shape_cast %23 : vector<8x196xf32> to vector<1x8x196xf32>
    tpu.vector_store %arg3[%c0_10, %c0_11, %c0_12], %26 {strides = array<i32>} : memref<1x8x196xf32, #tpu.memory_space<vmem>>, vector<1x8x196xf32>,
    return
  }
  func.func @transform_0(%arg0: i32) -> (i32, i32, i32) {
    %c0_i32 = arith.constant 0 : i32
    %c0_i32_0 = arith.constant 0 : i32
    %c0_i32_1 = arith.constant 0 : i32
    return %arg0, %c0_i32, %c0_i32_0 : i32, i32, i32
  }
  func.func @transform_1(%arg0: i32) -> (i32, i32) {
    %c0_i32 = arith.constant 0 : i32
    %c0_i32_0 = arith.constant 0 : i32
    %c0_i32_1 = arith.constant 0 : i32
    return %c0_i32, %c0_i32_0 : i32, i32
  }
  func.func @transform_2(%arg0: i32) -> (i32, i32, i32) {
    %c0_i32 = arith.constant 0 : i32
    %c0_i32_0 = arith.constant 0 : i32
    %c0_i32_1 = arith.constant 0 : i32
    return %arg0, %c0_i32, %c0_i32_0 : i32, i32, i32
  }
}

module attributes {stable_mosaic.version = 11 : i64} {
  func.func @_fused_conv_kernel(%arg0: i32, %arg1: memref<1x80x36xbf16, #tpu.memory_space<vmem>>, %arg2: memref<16x80xbf16, #tpu.memory_space<vmem>>, %arg3: memref<1x16x36xf32, #tpu.memory_space<vmem>>) attributes {dimension_semantics = [#tpu.dimension_semantics<parallel>], iteration_bounds = array<i64: 2>, scalar_prefetch = 0 : i64, scratch_operands = 0 : i64, tpu.core_type = #tpu.core_type<tc>, window_params = [{transform_indices = @transform_0, window_bounds = array<i64: 1, 80, 36>}, {pipeline_mode = #tpu.pipeline_mode<synchronous>, transform_indices = @transform_1, window_bounds = array<i64: 16, 80>}, {transform_indices = @transform_2, window_bounds = array<i64: 1, 16, 36>}]} {
    %c0 = arith.constant 0 : index
    %c0_0 = arith.constant 0 : index
    %0 = vector.load %arg2[%c0, %c0_0] : memref<16x80xbf16, #tpu.memory_space<vmem>>, vector<16x80xbf16>
    %c0_1 = arith.constant 0 : index
    %c0_2 = arith.constant 0 : index
    %c0_3 = arith.constant 0 : index
    %1 = vector.load %arg1[%c0_1, %c0_2, %c0_3] : memref<1x80x36xbf16, #tpu.memory_space<vmem>>, vector<1x80x36xbf16>
    %2 = vector.shape_cast %1 : vector<1x80x36xbf16> to vector<80x36xbf16>
    %cst = arith.constant dense<0.000000e+00> : vector<16x36xf32>
    %3 = tpu.matmul %0, %2, %cst {dimension_numbers = #tpu.dot_dimension_numbers<[1], [0], [0], [1], [0, 0, 1, 1], [], []>} : vector<16x80xbf16>, vector<80x36xbf16>, vector<16x36xf32> -> vector<16x36xf32>
    %cst_4 = arith.constant dense<0.000000e+00> : vector<16xf32>
    %4 = vector.multi_reduction <add>, %3, %cst_4 [1] : vector<16x36xf32> to vector<16xf32>
    %5 = vector.shape_cast %4 : vector<16xf32> to vector<16x1xf32>
    %cst_5 = arith.constant 3.600000e+01 : f32
    %6 = vector.broadcast %cst_5 : f32 to vector<16x1xf32>
    %7 = arith.divf %5, %6 : vector<16x1xf32>
    %8 = vector.broadcast %7 : vector<16x1xf32> to vector<16x36xf32>
    %9 = arith.subf %3, %8 : vector<16x36xf32>
    %10 = arith.mulf %9, %9 : vector<16x36xf32>
    %cst_6 = arith.constant dense<0.000000e+00> : vector<16xf32>
    %11 = vector.multi_reduction <add>, %10, %cst_6 [1] : vector<16x36xf32> to vector<16xf32>
    %12 = vector.shape_cast %11 : vector<16xf32> to vector<16x1xf32>
    %cst_7 = arith.constant 3.600000e+01 : f32
    %13 = vector.broadcast %cst_7 : f32 to vector<16x1xf32>
    %14 = arith.divf %12, %13 : vector<16x1xf32>
    %15 = vector.broadcast %7 : vector<16x1xf32> to vector<16x36xf32>
    %16 = arith.subf %3, %15 : vector<16x36xf32>
    %cst_8 = arith.constant 9.99999974E-6 : f32
    %17 = vector.broadcast %cst_8 : f32 to vector<16x1xf32>
    %18 = arith.addf %14, %17 : vector<16x1xf32>
    %19 = math.rsqrt %18 : vector<16x1xf32>
    %20 = vector.broadcast %19 : vector<16x1xf32> to vector<16x36xf32>
    %21 = arith.mulf %16, %20 : vector<16x36xf32>
    %cst_9 = arith.constant 0.000000e+00 : f32
    %22 = vector.broadcast %cst_9 : f32 to vector<16x36xf32>
    %23 = arith.maximumf %21, %22 : vector<16x36xf32>
    %c0_10 = arith.constant 0 : index
    %c0_11 = arith.constant 0 : index
    %c0_12 = arith.constant 0 : index
    %24 = vector.load %arg3[%c0_10, %c0_11, %c0_12] : memref<1x16x36xf32, #tpu.memory_space<vmem>>, vector<1x16x36xf32>
    %25 = vector.shape_cast %24 : vector<1x16x36xf32> to vector<16x36xf32>
    %26 = vector.shape_cast %23 : vector<16x36xf32> to vector<1x16x36xf32>
    tpu.vector_store %arg3[%c0_10, %c0_11, %c0_12], %26 {strides = array<i32>} : memref<1x16x36xf32, #tpu.memory_space<vmem>>, vector<1x16x36xf32>,
    return
  }
  func.func @transform_0(%arg0: i32) -> (i32, i32, i32) {
    %c0_i32 = arith.constant 0 : i32
    %c0_i32_0 = arith.constant 0 : i32
    %c0_i32_1 = arith.constant 0 : i32
    return %arg0, %c0_i32, %c0_i32_0 : i32, i32, i32
  }
  func.func @transform_1(%arg0: i32) -> (i32, i32) {
    %c0_i32 = arith.constant 0 : i32
    %c0_i32_0 = arith.constant 0 : i32
    %c0_i32_1 = arith.constant 0 : i32
    return %c0_i32, %c0_i32_0 : i32, i32
  }
  func.func @transform_2(%arg0: i32) -> (i32, i32, i32) {
    %c0_i32 = arith.constant 0 : i32
    %c0_i32_0 = arith.constant 0 : i32
    %c0_i32_1 = arith.constant 0 : i32
    return %arg0, %c0_i32, %c0_i32_0 : i32, i32, i32
  }
}

module attributes {stable_mosaic.version = 11 : i64} {
  func.func @_fused_conv_kernel(%arg0: i32, %arg1: memref<1x144x4xbf16, #tpu.memory_space<vmem>>, %arg2: memref<32x144xbf16, #tpu.memory_space<vmem>>, %arg3: memref<1x32x4xf32, #tpu.memory_space<vmem>>) attributes {dimension_semantics = [#tpu.dimension_semantics<parallel>], iteration_bounds = array<i64: 2>, scalar_prefetch = 0 : i64, scratch_operands = 0 : i64, tpu.core_type = #tpu.core_type<tc>, window_params = [{transform_indices = @transform_0, window_bounds = array<i64: 1, 144, 4>}, {pipeline_mode = #tpu.pipeline_mode<synchronous>, transform_indices = @transform_1, window_bounds = array<i64: 32, 144>}, {transform_indices = @transform_2, window_bounds = array<i64: 1, 32, 4>}]} {
    %c0 = arith.constant 0 : index
    %c0_0 = arith.constant 0 : index
    %0 = vector.load %arg2[%c0, %c0_0] : memref<32x144xbf16, #tpu.memory_space<vmem>>, vector<32x144xbf16>
    %c0_1 = arith.constant 0 : index
    %c0_2 = arith.constant 0 : index
    %c0_3 = arith.constant 0 : index
    %1 = vector.load %arg1[%c0_1, %c0_2, %c0_3] : memref<1x144x4xbf16, #tpu.memory_space<vmem>>, vector<1x144x4xbf16>
    %2 = vector.shape_cast %1 : vector<1x144x4xbf16> to vector<144x4xbf16>
    %cst = arith.constant dense<0.000000e+00> : vector<32x4xf32>
    %3 = tpu.matmul %0, %2, %cst {dimension_numbers = #tpu.dot_dimension_numbers<[1], [0], [0], [1], [0, 0, 1, 1], [], []>} : vector<32x144xbf16>, vector<144x4xbf16>, vector<32x4xf32> -> vector<32x4xf32>
    %cst_4 = arith.constant dense<0.000000e+00> : vector<32xf32>
    %4 = vector.multi_reduction <add>, %3, %cst_4 [1] : vector<32x4xf32> to vector<32xf32>
    %5 = vector.shape_cast %4 : vector<32xf32> to vector<32x1xf32>
    %cst_5 = arith.constant 4.000000e+00 : f32
    %6 = vector.broadcast %cst_5 : f32 to vector<32x1xf32>
    %7 = arith.divf %5, %6 : vector<32x1xf32>
    %8 = vector.broadcast %7 : vector<32x1xf32> to vector<32x4xf32>
    %9 = arith.subf %3, %8 : vector<32x4xf32>
    %10 = arith.mulf %9, %9 : vector<32x4xf32>
    %cst_6 = arith.constant dense<0.000000e+00> : vector<32xf32>
    %11 = vector.multi_reduction <add>, %10, %cst_6 [1] : vector<32x4xf32> to vector<32xf32>
    %12 = vector.shape_cast %11 : vector<32xf32> to vector<32x1xf32>
    %cst_7 = arith.constant 4.000000e+00 : f32
    %13 = vector.broadcast %cst_7 : f32 to vector<32x1xf32>
    %14 = arith.divf %12, %13 : vector<32x1xf32>
    %15 = vector.broadcast %7 : vector<32x1xf32> to vector<32x4xf32>
    %16 = arith.subf %3, %15 : vector<32x4xf32>
    %cst_8 = arith.constant 9.99999974E-6 : f32
    %17 = vector.broadcast %cst_8 : f32 to vector<32x1xf32>
    %18 = arith.addf %14, %17 : vector<32x1xf32>
    %19 = math.rsqrt %18 : vector<32x1xf32>
    %20 = vector.broadcast %19 : vector<32x1xf32> to vector<32x4xf32>
    %21 = arith.mulf %16, %20 : vector<32x4xf32>
    %cst_9 = arith.constant 0.000000e+00 : f32
    %22 = vector.broadcast %cst_9 : f32 to vector<32x4xf32>
    %23 = arith.maximumf %21, %22 : vector<32x4xf32>
    %c0_10 = arith.constant 0 : index
    %c0_11 = arith.constant 0 : index
    %c0_12 = arith.constant 0 : index
    %24 = vector.load %arg3[%c0_10, %c0_11, %c0_12] : memref<1x32x4xf32, #tpu.memory_space<vmem>>, vector<1x32x4xf32>
    %25 = vector.shape_cast %24 : vector<1x32x4xf32> to vector<32x4xf32>
    %26 = vector.shape_cast %23 : vector<32x4xf32> to vector<1x32x4xf32>
    tpu.vector_store %arg3[%c0_10, %c0_11, %c0_12], %26 {strides = array<i32>} : memref<1x32x4xf32, #tpu.memory_space<vmem>>, vector<1x32x4xf32>,
    return
  }
  func.func @transform_0(%arg0: i32) -> (i32, i32, i32) {
    %c0_i32 = arith.constant 0 : i32
    %c0_i32_0 = arith.constant 0 : i32
    %c0_i32_1 = arith.constant 0 : i32
    return %arg0, %c0_i32, %c0_i32_0 : i32, i32, i32
  }
  func.func @transform_1(%arg0: i32) -> (i32, i32) {
    %c0_i32 = arith.constant 0 : i32
    %c0_i32_0 = arith.constant 0 : i32
    %c0_i32_1 = arith.constant 0 : i32
    return %c0_i32, %c0_i32_0 : i32, i32
  }
  func.func @transform_2(%arg0: i32) -> (i32, i32, i32) {
    %c0_i32 = arith.constant 0 : i32
    %c0_i32_0 = arith.constant 0 : i32
    %c0_i32_1 = arith.constant 0 : i32
    return %arg0, %c0_i32, %c0_i32_0 : i32, i32, i32
  }
}

module attributes {stable_mosaic.version = 11 : i64} {
  func.func @_fused_conv_kernel(%arg0: i32, %arg1: memref<1x288x8xbf16, #tpu.memory_space<vmem>>, %arg2: memref<32x288xbf16, #tpu.memory_space<vmem>>, %arg3: memref<32x1xf32, #tpu.memory_space<vmem>>, %arg4: memref<32x1xf32, #tpu.memory_space<vmem>>, %arg5: memref<1x32x8xf32, #tpu.memory_space<vmem>>) attributes {dimension_semantics = [#tpu.dimension_semantics<parallel>], iteration_bounds = array<i64: 1>, scalar_prefetch = 0 : i64, scratch_operands = 0 : i64, tpu.core_type = #tpu.core_type<tc>, window_params = [{transform_indices = @transform_0, window_bounds = array<i64: 1, 288, 8>}, {pipeline_mode = #tpu.pipeline_mode<synchronous>, transform_indices = @transform_1, window_bounds = array<i64: 32, 288>}, {pipeline_mode = #tpu.pipeline_mode<synchronous>, transform_indices = @transform_2, window_bounds = array<i64: 32, 1>}, {pipeline_mode = #tpu.pipeline_mode<synchronous>, transform_indices = @transform_3, window_bounds = array<i64: 32, 1>}, {transform_indices = @transform_4, window_bounds = array<i64: 1, 32, 8>}]} {
    %c0 = arith.constant 0 : index
    %c0_0 = arith.constant 0 : index
    %0 = vector.load %arg2[%c0, %c0_0] : memref<32x288xbf16, #tpu.memory_space<vmem>>, vector<32x288xbf16>
    %c0_1 = arith.constant 0 : index
    %c0_2 = arith.constant 0 : index
    %c0_3 = arith.constant 0 : index
    %1 = vector.load %arg1[%c0_1, %c0_2, %c0_3] : memref<1x288x8xbf16, #tpu.memory_space<vmem>>, vector<1x288x8xbf16>
    %2 = vector.shape_cast %1 : vector<1x288x8xbf16> to vector<288x8xbf16>
    %cst = arith.constant dense<0.000000e+00> : vector<32x8xf32>
    %3 = tpu.matmul %0, %2, %cst {dimension_numbers = #tpu.dot_dimension_numbers<[1], [0], [0], [1], [0, 0, 1, 1], [], []>} : vector<32x288xbf16>, vector<288x8xbf16>, vector<32x8xf32> -> vector<32x8xf32>
    %cst_4 = arith.constant dense<0.000000e+00> : vector<32xf32>
    %4 = vector.multi_reduction <add>, %3, %cst_4 [1] : vector<32x8xf32> to vector<32xf32>
    %5 = vector.shape_cast %4 : vector<32xf32> to vector<32x1xf32>
    %cst_5 = arith.constant 8.000000e+00 : f32
    %6 = vector.broadcast %cst_5 : f32 to vector<32x1xf32>
    %7 = arith.divf %5, %6 : vector<32x1xf32>
    %8 = vector.broadcast %7 : vector<32x1xf32> to vector<32x8xf32>
    %9 = arith.subf %3, %8 : vector<32x8xf32>
    %10 = arith.mulf %9, %9 : vector<32x8xf32>
    %cst_6 = arith.constant dense<0.000000e+00> : vector<32xf32>
    %11 = vector.multi_reduction <add>, %10, %cst_6 [1] : vector<32x8xf32> to vector<32xf32>
    %12 = vector.shape_cast %11 : vector<32xf32> to vector<32x1xf32>
    %cst_7 = arith.constant 8.000000e+00 : f32
    %13 = vector.broadcast %cst_7 : f32 to vector<32x1xf32>
    %14 = arith.divf %12, %13 : vector<32x1xf32>
    %15 = vector.broadcast %7 : vector<32x1xf32> to vector<32x8xf32>
    %16 = arith.subf %3, %15 : vector<32x8xf32>
    %cst_8 = arith.constant 9.99999974E-6 : f32
    %17 = vector.broadcast %cst_8 : f32 to vector<32x1xf32>
    %18 = arith.addf %14, %17 : vector<32x1xf32>
    %19 = math.rsqrt %18 : vector<32x1xf32>
    %20 = vector.broadcast %19 : vector<32x1xf32> to vector<32x8xf32>
    %21 = arith.mulf %16, %20 : vector<32x8xf32>
    %c0_9 = arith.constant 0 : index
    %c0_10 = arith.constant 0 : index
    %22 = vector.load %arg3[%c0_9, %c0_10] : memref<32x1xf32, #tpu.memory_space<vmem>>, vector<32x1xf32>
    %23 = vector.broadcast %22 : vector<32x1xf32> to vector<32x8xf32>
    %24 = arith.mulf %21, %23 : vector<32x8xf32>
    %c0_11 = arith.constant 0 : index
    %c0_12 = arith.constant 0 : index
    %25 = vector.load %arg4[%c0_11, %c0_12] : memref<32x1xf32, #tpu.memory_space<vmem>>, vector<32x1xf32>
    %26 = vector.broadcast %25 : vector<32x1xf32> to vector<32x8xf32>
    %27 = arith.addf %24, %26 : vector<32x8xf32>
    %cst_13 = arith.constant 0.000000e+00 : f32
    %28 = vector.broadcast %cst_13 : f32 to vector<32x8xf32>
    %29 = arith.maximumf %27, %28 : vector<32x8xf32>
    %c0_14 = arith.constant 0 : index
    %c0_15 = arith.constant 0 : index
    %c0_16 = arith.constant 0 : index
    %30 = vector.load %arg5[%c0_14, %c0_15, %c0_16] : memref<1x32x8xf32, #tpu.memory_space<vmem>>, vector<1x32x8xf32>
    %31 = vector.shape_cast %30 : vector<1x32x8xf32> to vector<32x8xf32>
    %32 = vector.shape_cast %29 : vector<32x8xf32> to vector<1x32x8xf32>
    tpu.vector_store %arg5[%c0_14, %c0_15, %c0_16], %32 {strides = array<i32>} : memref<1x32x8xf32, #tpu.memory_space<vmem>>, vector<1x32x8xf32>,
    return
  }
  func.func @transform_0(%arg0: i32) -> (i32, i32, i32) {
    %c0_i32 = arith.constant 0 : i32
    %c0_i32_0 = arith.constant 0 : i32
    %c0_i32_1 = arith.constant 0 : i32
    return %arg0, %c0_i32, %c0_i32_0 : i32, i32, i32
  }
  func.func @transform_1(%arg0: i32) -> (i32, i32) {
    %c0_i32 = arith.constant 0 : i32
    %c0_i32_0 = arith.constant 0 : i32
    %c0_i32_1 = arith.constant 0 : i32
    return %c0_i32, %c0_i32_0 : i32, i32
  }
  func.func @transform_2(%arg0: i32) -> (i32, i32) {
    %c0_i32 = arith.constant 0 : i32
    %c0_i32_0 = arith.constant 0 : i32
    %c0_i32_1 = arith.constant 0 : i32
    return %c0_i32, %c0_i32_0 : i32, i32
  }
  func.func @transform_3(%arg0: i32) -> (i32, i32) {
    %c0_i32 = arith.constant 0 : i32
    %c0_i32_0 = arith.constant 0 : i32
    %c0_i32_1 = arith.constant 0 : i32
    return %c0_i32, %c0_i32_0 : i32, i32
  }
  func.func @transform_4(%arg0: i32) -> (i32, i32, i32) {
    %c0_i32 = arith.constant 0 : i32
    %c0_i32_0 = arith.constant 0 : i32
    %c0_i32_1 = arith.constant 0 : i32
    return %arg0, %c0_i32, %c0_i32_0 : i32, i32, i32
  }
}

module attributes {stable_mosaic.version = 11 : i64} {
  func.func @_fused_conv_kernel(%arg0: i32, %arg1: memref<1x288x8xbf16, #tpu.memory_space<vmem>>, %arg2: memref<32x288xbf16, #tpu.memory_space<vmem>>, %arg3: memref<32x1xf32, #tpu.memory_space<vmem>>, %arg4: memref<32x1xf32, #tpu.memory_space<vmem>>, %arg5: memref<1x32x8xf32, #tpu.memory_space<vmem>>, %arg6: memref<1x32x8xf32, #tpu.memory_space<vmem>>) attributes {dimension_semantics = [#tpu.dimension_semantics<parallel>], iteration_bounds = array<i64: 1>, scalar_prefetch = 0 : i64, scratch_operands = 0 : i64, tpu.core_type = #tpu.core_type<tc>, window_params = [{transform_indices = @transform_0, window_bounds = array<i64: 1, 288, 8>}, {pipeline_mode = #tpu.pipeline_mode<synchronous>, transform_indices = @transform_1, window_bounds = array<i64: 32, 288>}, {pipeline_mode = #tpu.pipeline_mode<synchronous>, transform_indices = @transform_2, window_bounds = array<i64: 32, 1>}, {pipeline_mode = #tpu.pipeline_mode<synchronous>, transform_indices = @transform_3, window_bounds = array<i64: 32, 1>}, {transform_indices = @transform_4, window_bounds = array<i64: 1, 32, 8>}, {transform_indices = @transform_5, window_bounds = array<i64: 1, 32, 8>}]} {
    %c0 = arith.constant 0 : index
    %c0_0 = arith.constant 0 : index
    %0 = vector.load %arg2[%c0, %c0_0] : memref<32x288xbf16, #tpu.memory_space<vmem>>, vector<32x288xbf16>
    %c0_1 = arith.constant 0 : index
    %c0_2 = arith.constant 0 : index
    %c0_3 = arith.constant 0 : index
    %1 = vector.load %arg1[%c0_1, %c0_2, %c0_3] : memref<1x288x8xbf16, #tpu.memory_space<vmem>>, vector<1x288x8xbf16>
    %2 = vector.shape_cast %1 : vector<1x288x8xbf16> to vector<288x8xbf16>
    %cst = arith.constant dense<0.000000e+00> : vector<32x8xf32>
    %3 = tpu.matmul %0, %2, %cst {dimension_numbers = #tpu.dot_dimension_numbers<[1], [0], [0], [1], [0, 0, 1, 1], [], []>} : vector<32x288xbf16>, vector<288x8xbf16>, vector<32x8xf32> -> vector<32x8xf32>
    %cst_4 = arith.constant dense<0.000000e+00> : vector<32xf32>
    %4 = vector.multi_reduction <add>, %3, %cst_4 [1] : vector<32x8xf32> to vector<32xf32>
    %5 = vector.shape_cast %4 : vector<32xf32> to vector<32x1xf32>
    %cst_5 = arith.constant 8.000000e+00 : f32
    %6 = vector.broadcast %cst_5 : f32 to vector<32x1xf32>
    %7 = arith.divf %5, %6 : vector<32x1xf32>
    %8 = vector.broadcast %7 : vector<32x1xf32> to vector<32x8xf32>
    %9 = arith.subf %3, %8 : vector<32x8xf32>
    %10 = arith.mulf %9, %9 : vector<32x8xf32>
    %cst_6 = arith.constant dense<0.000000e+00> : vector<32xf32>
    %11 = vector.multi_reduction <add>, %10, %cst_6 [1] : vector<32x8xf32> to vector<32xf32>
    %12 = vector.shape_cast %11 : vector<32xf32> to vector<32x1xf32>
    %cst_7 = arith.constant 8.000000e+00 : f32
    %13 = vector.broadcast %cst_7 : f32 to vector<32x1xf32>
    %14 = arith.divf %12, %13 : vector<32x1xf32>
    %15 = vector.broadcast %7 : vector<32x1xf32> to vector<32x8xf32>
    %16 = arith.subf %3, %15 : vector<32x8xf32>
    %cst_8 = arith.constant 9.99999974E-6 : f32
    %17 = vector.broadcast %cst_8 : f32 to vector<32x1xf32>
    %18 = arith.addf %14, %17 : vector<32x1xf32>
    %19 = math.rsqrt %18 : vector<32x1xf32>
    %20 = vector.broadcast %19 : vector<32x1xf32> to vector<32x8xf32>
    %21 = arith.mulf %16, %20 : vector<32x8xf32>
    %c0_9 = arith.constant 0 : index
    %c0_10 = arith.constant 0 : index
    %22 = vector.load %arg3[%c0_9, %c0_10] : memref<32x1xf32, #tpu.memory_space<vmem>>, vector<32x1xf32>
    %23 = vector.broadcast %22 : vector<32x1xf32> to vector<32x8xf32>
    %24 = arith.mulf %21, %23 : vector<32x8xf32>
    %c0_11 = arith.constant 0 : index
    %c0_12 = arith.constant 0 : index
    %25 = vector.load %arg4[%c0_11, %c0_12] : memref<32x1xf32, #tpu.memory_space<vmem>>, vector<32x1xf32>
    %26 = vector.broadcast %25 : vector<32x1xf32> to vector<32x8xf32>
    %27 = arith.addf %24, %26 : vector<32x8xf32>
    %c0_13 = arith.constant 0 : index
    %c0_14 = arith.constant 0 : index
    %c0_15 = arith.constant 0 : index
    %28 = vector.load %arg5[%c0_13, %c0_14, %c0_15] : memref<1x32x8xf32, #tpu.memory_space<vmem>>, vector<1x32x8xf32>
    %29 = vector.shape_cast %28 : vector<1x32x8xf32> to vector<32x8xf32>
    %30 = arith.addf %27, %29 : vector<32x8xf32>
    %c0_16 = arith.constant 0 : index
    %c0_17 = arith.constant 0 : index
    %c0_18 = arith.constant 0 : index
    %31 = vector.load %arg6[%c0_16, %c0_17, %c0_18] : memref<1x32x8xf32, #tpu.memory_space<vmem>>, vector<1x32x8xf32>
    %32 = vector.shape_cast %31 : vector<1x32x8xf32> to vector<32x8xf32>
    %33 = vector.shape_cast %30 : vector<32x8xf32> to vector<1x32x8xf32>
    tpu.vector_store %arg6[%c0_16, %c0_17, %c0_18], %33 {strides = array<i32>} : memref<1x32x8xf32, #tpu.memory_space<vmem>>, vector<1x32x8xf32>,
    return
  }
  func.func @transform_0(%arg0: i32) -> (i32, i32, i32) {
    %c0_i32 = arith.constant 0 : i32
    %c0_i32_0 = arith.constant 0 : i32
    %c0_i32_1 = arith.constant 0 : i32
    return %arg0, %c0_i32, %c0_i32_0 : i32, i32, i32
  }
  func.func @transform_1(%arg0: i32) -> (i32, i32) {
    %c0_i32 = arith.constant 0 : i32
    %c0_i32_0 = arith.constant 0 : i32
    %c0_i32_1 = arith.constant 0 : i32
    return %c0_i32, %c0_i32_0 : i32, i32
  }
  func.func @transform_2(%arg0: i32) -> (i32, i32) {
    %c0_i32 = arith.constant 0 : i32
    %c0_i32_0 = arith.constant 0 : i32
    %c0_i32_1 = arith.constant 0 : i32
    return %c0_i32, %c0_i32_0 : i32, i32
  }
  func.func @transform_3(%arg0: i32) -> (i32, i32) {
    %c0_i32 = arith.constant 0 : i32
    %c0_i32_0 = arith.constant 0 : i32
    %c0_i32_1 = arith.constant 0 : i32
    return %c0_i32, %c0_i32_0 : i32, i32
  }
  func.func @transform_4(%arg0: i32) -> (i32, i32, i32) {
    %c0_i32 = arith.constant 0 : i32
    %c0_i32_0 = arith.constant 0 : i32
    %c0_i32_1 = arith.constant 0 : i32
    return %arg0, %c0_i32, %c0_i32_0 : i32, i32, i32
  }
  func.func @transform_5(%arg0: i32) -> (i32, i32, i32) {
    %c0_i32 = arith.constant 0 : i32
    %c0_i32_0 = arith.constant 0 : i32
    %c0_i32_1 = arith.constant 0 : i32
    return %arg0, %c0_i32, %c0_i32_0 : i32, i32, i32
  }
}

module attributes {stable_mosaic.version = 11 : i64} {
  func.func @_fused_conv_kernel(%arg0: i32, %arg1: memref<1x288x25xbf16, #tpu.memory_space<vmem>>, %arg2: memref<16x288xbf16, #tpu.memory_space<vmem>>, %arg3: memref<1x16x25xf32, #tpu.memory_space<vmem>>) attributes {dimension_semantics = [#tpu.dimension_semantics<parallel>], iteration_bounds = array<i64: 2>, scalar_prefetch = 0 : i64, scratch_operands = 0 : i64, tpu.core_type = #tpu.core_type<tc>, window_params = [{transform_indices = @transform_0, window_bounds = array<i64: 1, 288, 25>}, {pipeline_mode = #tpu.pipeline_mode<synchronous>, transform_indices = @transform_1, window_bounds = array<i64: 16, 288>}, {transform_indices = @transform_2, window_bounds = array<i64: 1, 16, 25>}]} {
    %c0 = arith.constant 0 : index
    %c0_0 = arith.constant 0 : index
    %0 = vector.load %arg2[%c0, %c0_0] : memref<16x288xbf16, #tpu.memory_space<vmem>>, vector<16x288xbf16>
    %c0_1 = arith.constant 0 : index
    %c0_2 = arith.constant 0 : index
    %c0_3 = arith.constant 0 : index
    %1 = vector.load %arg1[%c0_1, %c0_2, %c0_3] : memref<1x288x25xbf16, #tpu.memory_space<vmem>>, vector<1x288x25xbf16>
    %2 = vector.shape_cast %1 : vector<1x288x25xbf16> to vector<288x25xbf16>
    %cst = arith.constant dense<0.000000e+00> : vector<16x25xf32>
    %3 = tpu.matmul %0, %2, %cst {dimension_numbers = #tpu.dot_dimension_numbers<[1], [0], [0], [1], [0, 0, 1, 1], [], []>} : vector<16x288xbf16>, vector<288x25xbf16>, vector<16x25xf32> -> vector<16x25xf32>
    %cst_4 = arith.constant dense<0.000000e+00> : vector<16xf32>
    %4 = vector.multi_reduction <add>, %3, %cst_4 [1] : vector<16x25xf32> to vector<16xf32>
    %5 = vector.shape_cast %4 : vector<16xf32> to vector<16x1xf32>
    %cst_5 = arith.constant 2.500000e+01 : f32
    %6 = vector.broadcast %cst_5 : f32 to vector<16x1xf32>
    %7 = arith.divf %5, %6 : vector<16x1xf32>
    %8 = vector.broadcast %7 : vector<16x1xf32> to vector<16x25xf32>
    %9 = arith.subf %3, %8 : vector<16x25xf32>
    %10 = arith.mulf %9, %9 : vector<16x25xf32>
    %cst_6 = arith.constant dense<0.000000e+00> : vector<16xf32>
    %11 = vector.multi_reduction <add>, %10, %cst_6 [1] : vector<16x25xf32> to vector<16xf32>
    %12 = vector.shape_cast %11 : vector<16xf32> to vector<16x1xf32>
    %cst_7 = arith.constant 2.500000e+01 : f32
    %13 = vector.broadcast %cst_7 : f32 to vector<16x1xf32>
    %14 = arith.divf %12, %13 : vector<16x1xf32>
    %15 = vector.broadcast %7 : vector<16x1xf32> to vector<16x25xf32>
    %16 = arith.subf %3, %15 : vector<16x25xf32>
    %cst_8 = arith.constant 9.99999974E-6 : f32
    %17 = vector.broadcast %cst_8 : f32 to vector<16x1xf32>
    %18 = arith.addf %14, %17 : vector<16x1xf32>
    %19 = math.rsqrt %18 : vector<16x1xf32>
    %20 = vector.broadcast %19 : vector<16x1xf32> to vector<16x25xf32>
    %21 = arith.mulf %16, %20 : vector<16x25xf32>
    %cst_9 = arith.constant 0.000000e+00 : f32
    %22 = vector.broadcast %cst_9 : f32 to vector<16x25xf32>
    %23 = arith.maximumf %21, %22 : vector<16x25xf32>
    %c0_10 = arith.constant 0 : index
    %c0_11 = arith.constant 0 : index
    %c0_12 = arith.constant 0 : index
    %24 = vector.load %arg3[%c0_10, %c0_11, %c0_12] : memref<1x16x25xf32, #tpu.memory_space<vmem>>, vector<1x16x25xf32>
    %25 = vector.shape_cast %24 : vector<1x16x25xf32> to vector<16x25xf32>
    %26 = vector.shape_cast %23 : vector<16x25xf32> to vector<1x16x25xf32>
    tpu.vector_store %arg3[%c0_10, %c0_11, %c0_12], %26 {strides = array<i32>} : memref<1x16x25xf32, #tpu.memory_space<vmem>>, vector<1x16x25xf32>,
    return
  }
  func.func @transform_0(%arg0: i32) -> (i32, i32, i32) {
    %c0_i32 = arith.constant 0 : i32
    %c0_i32_0 = arith.constant 0 : i32
    %c0_i32_1 = arith.constant 0 : i32
    return %arg0, %c0_i32, %c0_i32_0 : i32, i32, i32
  }
  func.func @transform_1(%arg0: i32) -> (i32, i32) {
    %c0_i32 = arith.constant 0 : i32
    %c0_i32_0 = arith.constant 0 : i32
    %c0_i32_1 = arith.constant 0 : i32
    return %c0_i32, %c0_i32_0 : i32, i32
  }
  func.func @transform_2(%arg0: i32) -> (i32, i32, i32) {
    %c0_i32 = arith.constant 0 : i32
    %c0_i32_0 = arith.constant 0 : i32
    %c0_i32_1 = arith.constant 0 : i32
    return %arg0, %c0_i32, %c0_i32_0 : i32, i32, i32
  }
}

module attributes {stable_mosaic.version = 11 : i64} {
  func.func @_fused_conv_kernel(%arg0: i32, %arg1: memref<1x144x121xbf16, #tpu.memory_space<vmem>>, %arg2: memref<8x144xbf16, #tpu.memory_space<vmem>>, %arg3: memref<1x8x121xf32, #tpu.memory_space<vmem>>) attributes {dimension_semantics = [#tpu.dimension_semantics<parallel>], iteration_bounds = array<i64: 2>, scalar_prefetch = 0 : i64, scratch_operands = 0 : i64, tpu.core_type = #tpu.core_type<tc>, window_params = [{transform_indices = @transform_0, window_bounds = array<i64: 1, 144, 121>}, {pipeline_mode = #tpu.pipeline_mode<synchronous>, transform_indices = @transform_1, window_bounds = array<i64: 8, 144>}, {transform_indices = @transform_2, window_bounds = array<i64: 1, 8, 121>}]} {
    %c0 = arith.constant 0 : index
    %c0_0 = arith.constant 0 : index
    %0 = vector.load %arg2[%c0, %c0_0] : memref<8x144xbf16, #tpu.memory_space<vmem>>, vector<8x144xbf16>
    %c0_1 = arith.constant 0 : index
    %c0_2 = arith.constant 0 : index
    %c0_3 = arith.constant 0 : index
    %1 = vector.load %arg1[%c0_1, %c0_2, %c0_3] : memref<1x144x121xbf16, #tpu.memory_space<vmem>>, vector<1x144x121xbf16>
    %2 = vector.shape_cast %1 : vector<1x144x121xbf16> to vector<144x121xbf16>
    %cst = arith.constant dense<0.000000e+00> : vector<8x121xf32>
    %3 = tpu.matmul %0, %2, %cst {dimension_numbers = #tpu.dot_dimension_numbers<[1], [0], [0], [1], [0, 0, 1, 1], [], []>} : vector<8x144xbf16>, vector<144x121xbf16>, vector<8x121xf32> -> vector<8x121xf32>
    %cst_4 = arith.constant dense<0.000000e+00> : vector<8xf32>
    %4 = vector.multi_reduction <add>, %3, %cst_4 [1] : vector<8x121xf32> to vector<8xf32>
    %5 = vector.shape_cast %4 : vector<8xf32> to vector<8x1xf32>
    %cst_5 = arith.constant 1.210000e+02 : f32
    %6 = vector.broadcast %cst_5 : f32 to vector<8x1xf32>
    %7 = arith.divf %5, %6 : vector<8x1xf32>
    %8 = vector.broadcast %7 : vector<8x1xf32> to vector<8x121xf32>
    %9 = arith.subf %3, %8 : vector<8x121xf32>
    %10 = arith.mulf %9, %9 : vector<8x121xf32>
    %cst_6 = arith.constant dense<0.000000e+00> : vector<8xf32>
    %11 = vector.multi_reduction <add>, %10, %cst_6 [1] : vector<8x121xf32> to vector<8xf32>
    %12 = vector.shape_cast %11 : vector<8xf32> to vector<8x1xf32>
    %cst_7 = arith.constant 1.210000e+02 : f32
    %13 = vector.broadcast %cst_7 : f32 to vector<8x1xf32>
    %14 = arith.divf %12, %13 : vector<8x1xf32>
    %15 = vector.broadcast %7 : vector<8x1xf32> to vector<8x121xf32>
    %16 = arith.subf %3, %15 : vector<8x121xf32>
    %cst_8 = arith.constant 9.99999974E-6 : f32
    %17 = vector.broadcast %cst_8 : f32 to vector<8x1xf32>
    %18 = arith.addf %14, %17 : vector<8x1xf32>
    %19 = math.rsqrt %18 : vector<8x1xf32>
    %20 = vector.broadcast %19 : vector<8x1xf32> to vector<8x121xf32>
    %21 = arith.mulf %16, %20 : vector<8x121xf32>
    %cst_9 = arith.constant 0.000000e+00 : f32
    %22 = vector.broadcast %cst_9 : f32 to vector<8x121xf32>
    %23 = arith.maximumf %21, %22 : vector<8x121xf32>
    %c0_10 = arith.constant 0 : index
    %c0_11 = arith.constant 0 : index
    %c0_12 = arith.constant 0 : index
    %24 = vector.load %arg3[%c0_10, %c0_11, %c0_12] : memref<1x8x121xf32, #tpu.memory_space<vmem>>, vector<1x8x121xf32>
    %25 = vector.shape_cast %24 : vector<1x8x121xf32> to vector<8x121xf32>
    %26 = vector.shape_cast %23 : vector<8x121xf32> to vector<1x8x121xf32>
    tpu.vector_store %arg3[%c0_10, %c0_11, %c0_12], %26 {strides = array<i32>} : memref<1x8x121xf32, #tpu.memory_space<vmem>>, vector<1x8x121xf32>,
    return
  }
  func.func @transform_0(%arg0: i32) -> (i32, i32, i32) {
    %c0_i32 = arith.constant 0 : i32
    %c0_i32_0 = arith.constant 0 : i32
    %c0_i32_1 = arith.constant 0 : i32
    return %arg0, %c0_i32, %c0_i32_0 : i32, i32, i32
  }
  func.func @transform_1(%arg0: i32) -> (i32, i32) {
    %c0_i32 = arith.constant 0 : i32
    %c0_i32_0 = arith.constant 0 : i32
    %c0_i32_1 = arith.constant 0 : i32
    return %c0_i32, %c0_i32_0 : i32, i32
  }
  func.func @transform_2(%arg0: i32) -> (i32, i32, i32) {
    %c0_i32 = arith.constant 0 : i32
    %c0_i32_0 = arith.constant 0 : i32
    %c0_i32_1 = arith.constant 0 : i32
    return %arg0, %c0_i32, %c0_i32_0 : i32, i32, i32
  }
}

module attributes {stable_mosaic.version = 11 : i64} {
  func.func @_fused_conv_kernel(%arg0: i32, %arg1: memref<1x288x256xbf16, #tpu.memory_space<vmem>>, %arg2: memref<3x288xbf16, #tpu.memory_space<vmem>>, %arg3: memref<1x3x256xf32, #tpu.memory_space<vmem>>) attributes {dimension_semantics = [#tpu.dimension_semantics<parallel>], iteration_bounds = array<i64: 2>, scalar_prefetch = 0 : i64, scratch_operands = 0 : i64, tpu.core_type = #tpu.core_type<tc>, window_params = [{transform_indices = @transform_0, window_bounds = array<i64: 1, 288, 256>}, {pipeline_mode = #tpu.pipeline_mode<synchronous>, transform_indices = @transform_1, window_bounds = array<i64: 3, 288>}, {transform_indices = @transform_2, window_bounds = array<i64: 1, 3, 256>}]} {
    %c0 = arith.constant 0 : index
    %c0_0 = arith.constant 0 : index
    %0 = vector.load %arg2[%c0, %c0_0] : memref<3x288xbf16, #tpu.memory_space<vmem>>, vector<3x288xbf16>
    %c0_1 = arith.constant 0 : index
    %c0_2 = arith.constant 0 : index
    %c0_3 = arith.constant 0 : index
    %1 = vector.load %arg1[%c0_1, %c0_2, %c0_3] : memref<1x288x256xbf16, #tpu.memory_space<vmem>>, vector<1x288x256xbf16>
    %2 = vector.shape_cast %1 : vector<1x288x256xbf16> to vector<288x256xbf16>
    %cst = arith.constant dense<0.000000e+00> : vector<3x256xf32>
    %3 = tpu.matmul %0, %2, %cst {dimension_numbers = #tpu.dot_dimension_numbers<[1], [0], [0], [1], [0, 0, 1, 1], [], []>} : vector<3x288xbf16>, vector<288x256xbf16>, vector<3x256xf32> -> vector<3x256xf32>
    %4 = math.tanh %3 : vector<3x256xf32>
    %c0_4 = arith.constant 0 : index
    %c0_5 = arith.constant 0 : index
    %c0_6 = arith.constant 0 : index
    %5 = vector.load %arg3[%c0_4, %c0_5, %c0_6] : memref<1x3x256xf32, #tpu.memory_space<vmem>>, vector<1x3x256xf32>
    %6 = vector.shape_cast %5 : vector<1x3x256xf32> to vector<3x256xf32>
    %7 = vector.shape_cast %4 : vector<3x256xf32> to vector<1x3x256xf32>
    tpu.vector_store %arg3[%c0_4, %c0_5, %c0_6], %7 {strides = array<i32>} : memref<1x3x256xf32, #tpu.memory_space<vmem>>, vector<1x3x256xf32>,
    return
  }
  func.func @transform_0(%arg0: i32) -> (i32, i32, i32) {
    %c0_i32 = arith.constant 0 : i32
    %c0_i32_0 = arith.constant 0 : i32
    %c0_i32_1 = arith.constant 0 : i32
    return %arg0, %c0_i32, %c0_i32_0 : i32, i32, i32
  }
  func.func @transform_1(%arg0: i32) -> (i32, i32) {
    %c0_i32 = arith.constant 0 : i32
    %c0_i32_0 = arith.constant 0 : i32
    %c0_i32_1 = arith.constant 0 : i32
    return %c0_i32, %c0_i32_0 : i32, i32
  }
  func.func @transform_2(%arg0: i32) -> (i32, i32, i32) {
    %c0_i32 = arith.constant 0 : i32
    %c0_i32_0 = arith.constant 0 : i32
    %c0_i32_1 = arith.constant 0 : i32
    return %arg0, %c0_i32, %c0_i32_0 : i32, i32, i32
  }
}

</mosaic_0001>

<bundles_post_ra>
// kernel: generator_forward.14
= control target key start
LH: loop header
LB: loop body
LE: loop exit
PB: predicated region body
PF: predicated region fallthrough
CT: control target
= control target key end

     0   :  { %s353_s9 = smov 0   ;;  %s380_s0 = inlined_call_operand.vmem [shape: bf16[2,32,196], index: 0, kind: input, shape index: {}]   ;;  %s381_s1 = inlined_call_operand.vmem [shape: bf16[8,32], index: 1, kind: input, shape index: {}]   ;;  %s382_s2 = inlined_call_operand.vmem [shape: f32[2,8,196], index: 2, kind: output, shape index: {}]  }
   0x1 LB: > { %s294_s10 = sadd.s32 4294967295, %s335_s9   ;;  %p298_p0 = scmp.ge.s32.totalorder %s335_s9, 1  ;;  %s335_s9 = sphi %s353_s9, %s12_s9  }
   0x2   : > { %p112_p1 = scmp.lt.s32.totalorder %s335_s9, 3 }
   0x4   : > { %p113_p2 = pnand %p298_p0, %p112_p1 }
   0x5   : > { %p134_p3 = scmp.lt.s32.totalorder (!%p113_p2), %s294_s10, 1 }
   0x6   : > { %116 = sbr.rel (%p113_p2) target bundleno = 529 (0x211), region = 28 }
   0xb   : > { %v337_v0 = vmov 0   ;;  %s384_s10 = smov (!%p134_p3, %s294_s10), 1  ;;  %v145_v5 = vld [vmem:[%s381_s1] sm:$0xf]  ;;  %vm170_vm0 = vcmask 261120   ;;  %vm215_vm1 = vcmask 556032  }
   0xc   : > { %206 = vmatprep.mubr.bf16.mxu0 %v337_v0  ;;  %s310_s11 = sshll.u32 %s384_s10, 5  ;;  %s311_s17 = sshll.u32 %s384_s10, 4 }
   0xd   : > { %s138_s14 = scalar_lea.vmem %s380_s0, %s310_s11  ;;  %s143_s20 = scalar_lea.vmem %s382_s2, %s311_s17 }
   0xe   : > { %v321_v1 = vld [vmem:[%s138_s14 + $0x14] ss:$8 sps:$4 sm:$0xff]   ;;  %v323_v2 = vld [vmem:[%s138_s14 + $0x10] ss:$8 sps:$4 sm:$0xff]   ;;  %v324_v3 = vld [vmem:[%s138_s14 + $0x4] ss:$8 sps:$4 sm:$0xff]  }
   0xf   : > { %186 = vmatprep.subr.bf16.mxu0 %v321_v1  ;;  %v326_v4 = vld [vmem:[%s138_s14] ss:$8 sps:$4 sm:$0xff]  }
  0x10   : > { %187 = vmatpush1.bf16.msra.mxu0 %v323_v2 }
  0x11   : > { %188 = vmatprep.subr.bf16.mxu0 %v324_v3 }
  0x14   : > { %189 = vmatpush1.bf16.msra.mxu0 %v326_v4 }
  0x17   : > { %307 = vmatmul.mubr.msk.bf16.vlgmr.msra.gmra.mxu0 %vm170_vm0, %v145_v5 }
  0xd7   : > { %v208_v6 = vpop.f32.mrf.mxu0 }
  0xd9   : > { %v210_v7 = vpop.f32.mrf.mxu0 }
  0xda   : > { %v216_v8 = vsel %vm215_vm1, %v210_v7, 0.0 }
  0xdb   : > { %v212_v9 = vpop.f32.mrf.mxu0  ;;  %v217_v10 = vadd.f32 %v216_v8, %v208_v6 }
  0xdd   : > { %218 = vadd.xlane.f32.xlu0 %v217_v10  ;;  %v213_v11 = vpop.f32.mrf.mxu0 }
 0x166   : > { %v219_v12 = vpop.xlane.xlu0 %218 }
 0x167   : > { %v221_v13 = vmul.f32 0.0051020407, %v219_v12 }
 0x169   : > { %v222_v14 = vsub.f32 %v208_v6, %v221_v13  ;;  %v223_v15 = vsub.f32 %v210_v7, %v221_v13 }
 0x16b   : > { %v224_v16 = vmul.f32 %v222_v14, %v222_v14  ;;  %v225_v17 = vmul.f32 %v223_v15, %v223_v15 }
 0x16d   : > { %v226_v18 = vsel %vm215_vm1, %v225_v17, 0.0 }
 0x16e   : > { %v227_v19 = vadd.f32 %v226_v18, %v224_v16 }
 0x170   : > { %228 = vadd.xlane.f32.xlu0 %v227_v19 }
 0x1f9   : > { %v229_v20 = vpop.xlane.xlu0 %228 }
 0x1fa   : > { %v230_v21 = vmul.f32 0.0051020407, %v229_v20 }
 0x1fc   : > { %v231_v22 = vadd.f32 1e-05, %v230_v21 }
 0x1fe   : > { %327 = vrsqrt.f32 %v231_v22 }
 0x20b   : > { %v328_v23 = vpop.eup %327 }
 0x20c   : > { %v233_v24 = vmul.f32 %v328_v23, %v222_v14  ;;  %v234_v25 = vmul.f32 %v328_v23, %v223_v15 }
 0x20e   : > { %v235_v26 = vmax.f32 %v233_v24, 0.0  ;;  %v236_v27 = vmax.f32 %v234_v25, 0.0 }
 0x210   : > { %237 = vst [vmem:[%s143_s20] sm:$0xff] %v235_v26  ;;  %238 = vst.msk [vmem:[%s143_s20 + $0x8] sm:$0xff] %vm215_vm1, %v236_v27 }
 0x211 PF: > { %s12_s9 = sadd.s32 1, %s335_s9  }
 0x212   : > { %p9_p4 = scmp.ge.s32.totalorder %s12_s9, 4  }
 0x214   :  { %11 = sbr.rel (!%p9_p4) target bundleno = 1 (0x1), region = 58 }

// kernel: generator_forward.15
= control target key start
LH: loop header
LB: loop body
LE: loop exit
PB: predicated region body
PF: predicated region fallthrough
CT: control target
= control target key end

     0   :  { %s408_s9 = smov 0   ;;  %s438_s0 = inlined_call_operand.vmem [shape: bf16[2,80,36], index: 0, kind: input, shape index: {}]   ;;  %s439_s1 = inlined_call_operand.vmem [shape: bf16[16,80], index: 1, kind: input, shape index: {}]   ;;  %s440_s2 = inlined_call_operand.vmem [shape: f32[2,16,36], index: 2, kind: output, shape index: {}]  }
   0x1 LB: > { %s324_s10 = sadd.s32 4294967295, %s389_s9   ;;  %p328_p0 = scmp.ge.s32.totalorder %s389_s9, 1  ;;  %s389_s9 = sphi %s408_s9, %s12_s9  }
   0x2   : > { %p112_p1 = scmp.lt.s32.totalorder %s389_s9, 3 }
   0x4   : > { %p113_p2 = pnand %p328_p0, %p112_p1 }
   0x5   : > { %p134_p3 = scmp.lt.s32.totalorder (!%p113_p2), %s324_s10, 1 }
   0x6   : > { %116 = sbr.rel (%p113_p2) target bundleno = 539 (0x21b), region = 28 }
   0xb   : > { %v391_v0 = vmov 0.0   ;;  %vm392_vm0 = vmmov 0   ;;  %s442_s10 = smov (!%p134_p3, %s324_s10), 1  ;;  %v378_v6 = vld [vmem:[%s439_s1] sm:$0xff]   ;;  %vm192_vm1 = vcmask 654336   ;;  %vm237_vm2 = vcmask 293888  }
   0xc   : > { %348 = vmatprep.subr.bf16.mxu0 %v391_v0  ;;  %358 = vmatprep.mubr.msk.bf16.mxu0 %vm392_vm0, %v391_v0  ;;  %s362_s11 = smul.u32 40, %s442_s10  ;;  %s341_s17 = sshll.u32 %s442_s10, 4 }
   0xd   : > { %s143_s20 = scalar_lea.vmem %s440_s2, %s341_s17 }
   0xe   : > { %s138_s14 = scalar_lea.vmem %s438_s0, %s362_s11 }
   0xf   : > { %v373_v1 = vld [vmem:[%s138_s14 + $0x20] sm:$0xff]   ;;  %v374_v2 = vld [vmem:[%s138_s14 + $0x18] sm:$0xff]   ;;  %v375_v3 = vld [vmem:[%s138_s14 + $0x10] sm:$0xff]  }
  0x10   : > { %349 = vmatpush3.bf16.msra.mxu0 %v373_v1  ;;  %v376_v4 = vld [vmem:[%s138_s14 + $0x8] sm:$0xff]   ;;  %v377_v5 = vld [vmem:[%s138_s14] sm:$0xff]  }
  0x11   : > { %350 = vmatprep.subr.bf16.mxu0 %v391_v0 }
  0x14   : > { %351 = vmatpush3.bf16.msra.mxu0 %v374_v2 }
  0x15   : > { %352 = vmatprep.subr.bf16.mxu0 %v391_v0 }
  0x18   : > { %353 = vmatpush3.bf16.msra.mxu0 %v375_v3 }
  0x19   : > { %354 = vmatprep.subr.bf16.mxu0 %v391_v0 }
  0x1c   : > { %355 = vmatpush3.bf16.msra.mxu0 %v376_v4 }
  0x1d   : > { %356 = vmatprep.subr.bf16.mxu0 %v391_v0 }
  0x20   : > { %357 = vmatpush3.bf16.msra.mxu0 %v377_v5 }
  0x23   : > { %359 = vmatmul.mubr.msk.bf16.vlgmr.msra.gmra.mxu0 %vm192_vm1, %v378_v6 }
  0xe3   : > { %v230_v7 = vpop.f32.mrf.mxu0 }
  0xe4   : > { %v238_v8 = vsel %vm237_vm2, %v230_v7, 0.0 }
  0xe5   : > { %239 = vadd.xlane.f32.xlu0 %v238_v8  ;;  %v360_v9 = vpop.f32.mrf.mxu0 }
  0xe7   : > { %v233_v10 = vpop.f32.mrf.mxu0 }
  0xe8   : > { %v241_v11 = vsel %vm237_vm2, %v233_v10, 0.0 }
  0xe9   : > { %242 = vadd.xlane.f32.xlu0 %v241_v11  ;;  %v361_v12 = vpop.f32.mrf.mxu0 }
 0x16e   : > { %v240_v13 = vpop.xlane.xlu0 %239 }
 0x16f   : > { %v245_v14 = vmul.f32 0.027777778, %v240_v13 }
 0x171   : > { %v247_v15 = vsub.f32 %v230_v7, %v245_v14 }
 0x172   : > { %v243_v16 = vpop.xlane.xlu0 %242 }
 0x173   : > { %v246_v17 = vmul.f32 0.027777778, %v243_v16  ;;  %v249_v18 = vmul.f32 %v247_v15, %v247_v15 }
 0x175   : > { %v248_v19 = vsub.f32 %v233_v10, %v246_v17  ;;  %v251_v20 = vsel %vm237_vm2, %v249_v18, 0.0 }
 0x176   : > { %252 = vadd.xlane.f32.xlu1 %v251_v20 }
 0x177   : > { %v250_v21 = vmul.f32 %v248_v19, %v248_v19 }
 0x179   : > { %v254_v22 = vsel %vm237_vm2, %v250_v21, 0.0 }
 0x17a   : > { %255 = vadd.xlane.f32.xlu1 %v254_v22 }
 0x1ff   : > { %v253_v23 = vpop.xlane.xlu1 %252 }
 0x200   : > { %v257_v24 = vmul.f32 0.027777778, %v253_v23 }
 0x202   : > { %v259_v25 = vadd.f32 1e-05, %v257_v24 }
 0x203   : > { %v256_v26 = vpop.xlane.xlu1 %255 }
 0x204   : > { %379 = vrsqrt.f32 %v259_v25  ;;  %v258_v27 = vmul.f32 0.027777778, %v256_v26 }
 0x206   : > { %v260_v28 = vadd.f32 1e-05, %v258_v27 }
 0x208   : > { %381 = vrsqrt.f32 %v260_v28 }
 0x211   : > { %v380_v29 = vpop.eup %379 }
 0x212   : > { %v263_v30 = vmul.f32 %v380_v29, %v247_v15 }
 0x214   : > { %v265_v31 = vmax.f32 %v263_v30, 0.0 }
 0x215   : > { %v382_v32 = vpop.eup %381 }
 0x216   : > { %267 = vst.msk [vmem:[%s143_s20] sm:$0xff] %vm237_vm2, %v265_v31  ;;  %v264_v33 = vmul.f32 %v382_v32, %v248_v19 }
 0x218   : > { %v266_v34 = vmax.f32 %v264_v33, 0.0 }
 0x21a   : > { %268 = vst.msk [vmem:[%s143_s20 + $0x8] sm:$0xff] %vm237_vm2, %v266_v34 }
 0x21b PF: > { %s12_s9 = sadd.s32 1, %s389_s9  }
 0x21c   : > { %p9_p4 = scmp.ge.s32.totalorder %s12_s9, 4  }
 0x21e   :  { %11 = sbr.rel (!%p9_p4) target bundleno = 1 (0x1), region = 58 }

// kernel: generator_forward.16
= control target key start
LH: loop header
LB: loop body
LE: loop exit
PB: predicated region body
PF: predicated region fallthrough
CT: control target
= control target key end

     0   :  { %s513_s9 = smov 0   ;;  %s569_s0 = inlined_call_operand.vmem [shape: bf16[2,144,4], index: 0, kind: input, shape index: {}]   ;;  %s570_s1 = inlined_call_operand.vmem [shape: bf16[32,144], index: 1, kind: input, shape index: {}]   ;;  %s571_s2 = inlined_call_operand.vmem [shape: f32[2,32,4], index: 2, kind: output, shape index: {}]  }
   0x1 LB: > { %s412_s10 = sadd.s32 4294967295, %s495_s9   ;;  %p416_p0 = scmp.ge.s32.totalorder %s495_s9, 1  ;;  %s495_s9 = sphi %s513_s9, %s12_s9  }
   0x2   : > { %p112_p1 = scmp.lt.s32.totalorder %s495_s9, 3 }
   0x4   : > { %p113_p2 = pnand %p416_p0, %p112_p1 }
   0x5   : > { %p134_p3 = scmp.lt.s32.totalorder (!%p113_p2), %s412_s10, 1 }
   0x6   : > { %116 = sbr.rel (%p113_p2) target bundleno = 559 (0x22f), region = 28 }
   0xb   : > { %v497_v0 = vmov 0   ;;  %v477_v1 = vld [vmem:[%s570_s1 + $0x4] ss:$8 sps:$4 sm:$0xff]   ;;  %vm239_vm0 = vcmask 130048   ;;  %s573_s10 = smov (!%p134_p3, %s412_s10), 1  ;;  %vm295_vm1 = vcmask 31744  }
   0xc   : > { %246 = vmatprep.subr.bf16.mxu0 %v497_v0  ;;  %438 = vmatprep.subr.bf16.mxu1 %v497_v0  ;;  %v480_v2 = vld [vmem:[%s570_s1 + $0x14] ss:$8 sps:$4 sm:$0xff]   ;;  %s456_s15 = smul.u32 72, %s573_s10  ;;  %v475_v12 = vld [vmem:[%s570_s1] ss:$8 sps:$4 sm:$0xff]   ;;  %s437_s23 = sshll.u32 %s573_s10, 5 }
   0xd   : > { %433 = vmatprep.mubr.msk.bf16.mxu0 %vm239_vm0, %v477_v1  ;;  %434 = vmatprep.mubr.msk.bf16.mxu1 %vm239_vm0, %v480_v2  ;;  %v478_v13 = vld [vmem:[%s570_s1 + $0x10] ss:$8 sps:$4 sm:$0xff]   ;;  %s143_s26 = scalar_lea.vmem %s571_s2, %s437_s23 }
   0xe   : > { %s533_s18 = scalar_lea.vmem %s569_s0, %s456_s15 }
   0xf   : > { %v466_v3 = vld [vmem:[%s533_s18 + $0x38] sm:$0xff]   ;;  %v467_v4 = vld [vmem:[%s533_s18 + $0x30] sm:$0xff]   ;;  %v468_v5 = vld [vmem:[%s533_s18 + $0x28] sm:$0xff]  }
  0x10   : > { %247 = vmatpush1.bf16.msra.mxu0 %v466_v3  ;;  %447 = vmatpush1.bf16.msra.mxu1 %v466_v3  ;;  %v469_v6 = vld [vmem:[%s533_s18 + $0x20] sm:$0xff]   ;;  %v470_v7 = vld [vmem:[%s533_s18 + $0x18] sm:$0xff]   ;;  %v471_v8 = vld [vmem:[%s533_s18 + $0x10] sm:$0xff]  }
  0x11   : > { %248 = vmatprep.subr.bf16.mxu0 %v497_v0  ;;  %439 = vmatprep.subr.bf16.mxu1 %v497_v0  ;;  %v472_v9 = vld [vmem:[%s533_s18 + $0x8] sm:$0xff]   ;;  %v473_v10 = vld [vmem:[%s533_s18] sm:$0xff]  }
  0x12   : > { %v474_v11 = vld [vmem:[%s533_s18 + $0x40] sm:$0xff]  }
  0x14   : > { %249 = vmatpush1.bf16.msra.mxu0 %v467_v4  ;;  %448 = vmatpush1.bf16.msra.mxu1 %v467_v4 }
  0x15   : > { %250 = vmatprep.subr.bf16.mxu0 %v497_v0  ;;  %440 = vmatprep.subr.bf16.mxu1 %v497_v0 }
  0x18   : > { %251 = vmatpush1.bf16.msra.mxu0 %v468_v5  ;;  %449 = vmatpush1.bf16.msra.mxu1 %v468_v5 }
  0x19   : > { %252 = vmatprep.subr.bf16.mxu0 %v497_v0  ;;  %441 = vmatprep.subr.bf16.mxu1 %v497_v0 }
  0x1c   : > { %253 = vmatpush1.bf16.msra.mxu0 %v469_v6  ;;  %450 = vmatpush1.bf16.msra.mxu1 %v469_v6 }
  0x1d   : > { %254 = vmatprep.subr.bf16.mxu0 %v497_v0  ;;  %442 = vmatprep.subr.bf16.mxu1 %v497_v0 }
  0x20   : > { %255 = vmatpush1.bf16.msra.mxu0 %v470_v7  ;;  %451 = vmatpush1.bf16.msra.mxu1 %v470_v7 }
  0x21   : > { %256 = vmatprep.subr.bf16.mxu0 %v497_v0  ;;  %443 = vmatprep.subr.bf16.mxu1 %v497_v0 }
  0x24   : > { %257 = vmatpush1.bf16.msra.mxu0 %v471_v8  ;;  %452 = vmatpush1.bf16.msra.mxu1 %v471_v8 }
  0x25   : > { %258 = vmatprep.subr.bf16.mxu0 %v497_v0  ;;  %444 = vmatprep.subr.bf16.mxu1 %v497_v0 }
  0x28   : > { %259 = vmatpush1.bf16.msra.mxu0 %v472_v9  ;;  %453 = vmatpush1.bf16.msra.mxu1 %v472_v9 }
  0x29   : > { %260 = vmatprep.subr.bf16.mxu0 %v497_v0  ;;  %445 = vmatprep.subr.bf16.mxu1 %v497_v0 }
  0x2c   : > { %261 = vmatpush1.bf16.msra.mxu0 %v473_v10  ;;  %454 = vmatpush1.bf16.msra.mxu1 %v473_v10 }
  0x2d   : > { %276 = vmatprep.subr.bf16.mxu0 %v497_v0  ;;  %446 = vmatprep.subr.bf16.mxu1 %v497_v0 }
  0x30   : > { %277 = vmatpush2.bf16.msra.mxu0 %v474_v11  ;;  %455 = vmatpush2.bf16.msra.mxu1 %v474_v11 }
  0x33   : > { %279 = vmatmul.mubr.bf16.vlgmr.msra.gmra.mxu0 %v475_v12  ;;  %287 = vmatmul.mubr.bf16.vlgmr.msra.gmra.mxu1 %v478_v13 }
  0xf3   : > { %v280_v14 = vpop.f32.mrf.mxu0  ;;  %v288_v15 = vpop.f32.mrf.mxu1 }
  0xf4   : > { %v302_v16 = vsel %vm295_vm1, %v288_v15, 0.0  ;;  %v296_v17 = vsel %vm295_vm1, %v280_v14, 0.0 }
  0xf5   : > { %303 = vadd.xlane.f32.xlu1 %v302_v16  ;;  %v290_v18 = vpop.f32.mrf.mxu1  ;;  %297 = vadd.xlane.f32.xlu0 %v296_v17  ;;  %v282_v19 = vpop.f32.mrf.mxu0 }
  0xf7   : > { %v283_v20 = vpop.f32.mrf.mxu0  ;;  %v291_v21 = vpop.f32.mrf.mxu1 }
  0xf8   : > { %v305_v22 = vsel %vm295_vm1, %v291_v21, 0.0  ;;  %v299_v23 = vsel %vm295_vm1, %v283_v20, 0.0 }
  0xf9   : > { %306 = vadd.xlane.f32.xlu1 %v305_v22  ;;  %v293_v24 = vpop.f32.mrf.mxu1  ;;  %300 = vadd.xlane.f32.xlu0 %v299_v23  ;;  %v285_v25 = vpop.f32.mrf.mxu0 }
 0x17e   : > { %v304_v26 = vpop.xlane.xlu1 %303  ;;  %v298_v27 = vpop.xlane.xlu0 %297 }
 0x17f   : > { %v311_v28 = vmul.f32 0.25, %v304_v26  ;;  %v309_v29 = vmul.f32 0.25, %v298_v27 }
 0x181   : > { %v315_v30 = vsub.f32 %v288_v15, %v311_v28  ;;  %v313_v31 = vsub.f32 %v280_v14, %v309_v29 }
 0x182   : > { %v307_v32 = vpop.xlane.xlu1 %306  ;;  %v301_v33 = vpop.xlane.xlu0 %300 }
 0x183   : > { %v312_v34 = vmul.f32 0.25, %v307_v32  ;;  %v310_v35 = vmul.f32 0.25, %v301_v33  ;;  %v317_v36 = vmul.f32 %v313_v31, %v313_v31  ;;  %v319_v40 = vmul.f32 %v315_v30, %v315_v30 }
 0x185   : > { %v316_v37 = vsub.f32 %v291_v21, %v312_v34  ;;  %v314_v38 = vsub.f32 %v283_v20, %v310_v35  ;;  %v321_v39 = vsel %vm295_vm1, %v317_v36, 0.0  ;;  %v327_v42 = vsel %vm295_vm1, %v319_v40, 0.0 }
 0x186   : > { %322 = vadd.xlane.f32.xlu0 %v321_v39 }
 0x187   : > { %v318_v41 = vmul.f32 %v314_v38, %v314_v38  ;;  %v320_v44 = vmul.f32 %v316_v37, %v316_v37 }
 0x189   : > { %v324_v43 = vsel %vm295_vm1, %v318_v41, 0.0  ;;  %v330_v45 = vsel %vm295_vm1, %v320_v44, 0.0 }
 0x18a   : > { %328 = vadd.xlane.f32.xlu0 %v327_v42  ;;  %325 = vadd.xlane.f32.xlu1 %v324_v43 }
 0x18e   : > { %331 = vadd.xlane.f32.xlu1 %v330_v45 }
 0x20f   : > { %v323_v46 = vpop.xlane.xlu0 %322 }
 0x210   : > { %v333_v47 = vmul.f32 0.25, %v323_v46 }
 0x212   : > { %v337_v48 = vadd.f32 1e-05, %v333_v47 }
 0x213   : > { %v326_v49 = vpop.xlane.xlu1 %325  ;;  %v329_v50 = vpop.xlane.xlu0 %328 }
 0x214   : > { %481 = vrsqrt.f32 %v337_v48  ;;  %v334_v51 = vmul.f32 0.25, %v326_v49  ;;  %v335_v52 = vmul.f32 0.25, %v329_v50 }
 0x216   : > { %v338_v53 = vadd.f32 1e-05, %v334_v51  ;;  %v339_v54 = vadd.f32 1e-05, %v335_v52 }
 0x217   : > { %v332_v55 = vpop.xlane.xlu1 %331 }
 0x218   : > { %483 = vrsqrt.f32 %v338_v53  ;;  %v336_v56 = vmul.f32 0.25, %v332_v55 }
 0x219   : > { %485 = vrsqrt.f32 %v339_v54 }
 0x21a   : > { %v340_v57 = vadd.f32 1e-05, %v336_v56 }
 0x21c   : > { %487 = vrsqrt.f32 %v340_v57 }
 0x221   : > { %v482_v58 = vpop.eup %481 }
 0x222   : > { %v345_v59 = vmul.f32 %v482_v58, %v313_v31 }
 0x224   : > { %v349_v60 = vmax.f32 %v345_v59, 0.0 }
 0x225   : > { %v484_v61 = vpop.eup %483 }
 0x226   : > { %v486_v62 = vpop.eup %485  ;;  %353 = vst.msk [vmem:[%s143_s26] sm:$0xff] %vm295_vm1, %v349_v60  ;;  %v346_v63 = vmul.f32 %v484_v61, %v314_v38 }
 0x227   : > { %v347_v0 = vmul.f32 %v486_v62, %v315_v30 }
 0x228   : > { %v350_v1 = vmax.f32 %v346_v63, 0.0 }
 0x229   : > { %v488_v2 = vpop.eup %487  ;;  %v351_v3 = vmax.f32 %v347_v0, 0.0 }
 0x22a   : > { %354 = vst.msk [vmem:[%s143_s26 + $0x8] sm:$0xff] %vm295_vm1, %v350_v1  ;;  %v348_v4 = vmul.f32 %v488_v2, %v316_v37 }
 0x22b   : > { %355 = vst.msk [vmem:[%s143_s26 + $0x10] sm:$0xff] %vm295_vm1, %v351_v3 }
 0x22c   : > { %v352_v5 = vmax.f32 %v348_v4, 0.0 }
 0x22e   : > { %356 = vst.msk [vmem:[%s143_s26 + $0x18] sm:$0xff] %vm295_vm1, %v352_v5 }
 0x22f PF: > { %s12_s9 = sadd.s32 1, %s495_s9  }
 0x230   : > { %p9_p4 = scmp.ge.s32.totalorder %s12_s9, 4  }
 0x232   :  { %11 = sbr.rel (!%p9_p4) target bundleno = 1 (0x1), region = 58 }

// kernel: generator_forward.17
= control target key start
LH: loop header
LB: loop body
LE: loop exit
PB: predicated region body
PF: predicated region fallthrough
CT: control target
= control target key end

     0   :  { %vm200_vm0 = vcmask 261120   ;;  %vm305_vm1 = vcmask 64512   ;;  %v530_v48 = vmov 0   ;;  %s676_s0 = inlined_call_operand.vmem [shape: bf16[1,288,8], index: 0, kind: input, shape index: {}]   ;;  %s677_s1 = inlined_call_operand.vmem [shape: bf16[32,288], index: 1, kind: input, shape index: {}]   ;;  %s678_s2 = inlined_call_operand.vmem [shape: f32[32,1], index: 2, kind: input, shape index: {}]   ;;  %s679_s3 = inlined_call_operand.vmem [shape: f32[32,1], index: 3, kind: input, shape index: {}]   ;;  %s680_s4 = inlined_call_operand.vmem [shape: f32[1,32,8], index: 4, kind: output, shape index: {}]  }
   0x1   :  { %v496_v0 = vld [vmem:[%s676_s0 + $0x78] sm:$0xff]   ;;  %v498_v2 = vld [vmem:[%s676_s0 + $0x70] sm:$0xff]   ;;  %v500_v4 = vld [vmem:[%s676_s0 + $0x68] sm:$0xff]   ;;  %495 = vset.pattern.permute.xlu1 %v530_v48  ;;  %494 = vset.pattern.permute.xlu0 %v530_v48 }
   0x2   :  { %v497_v1 = vld [vmem:[%s676_s0 + $0x38] sm:$0xff]   ;;  %453 = vmatprep.subr.bf16.mxu0 %v496_v0  ;;  %v499_v3 = vld [vmem:[%s676_s0 + $0x30] sm:$0xff]   ;;  %v501_v5 = vld [vmem:[%s676_s0 + $0x28] sm:$0xff]  }
   0x3   :  { %454 = vmatpush3.bf16.msra.mxu0 %v497_v1  ;;  %v502_v6 = vld [vmem:[%s676_s0 + $0x60] sm:$0xff]   ;;  %v507_v8 = vld [vmem:[%s676_s0 + $0x88] sm:$0xff]   ;;  %v504_v9 = vld [vmem:[%s676_s0 + $0x58] sm:$0xff]  }
   0x4   :  { %455 = vmatprep.subr.bf16.mxu0 %v498_v2  ;;  %v503_v7 = vld [vmem:[%s676_s0 + $0x20] sm:$0xff]   ;;  %v505_v10 = vld [vmem:[%s676_s0 + $0x18] sm:$0xff]   ;;  %485 = vmatprep.subr.bf16.mxu1 %v507_v8  ;;  %v506_v12 = vld [vmem:[%s676_s0 + $0x50] sm:$0xff]  }
   0x5   :  { %486 = vmatpush3.bf16.msra.mxu1 %v507_v8  ;;  %v510_v11 = vld [vmem:[%s676_s0 + $0x80] sm:$0xff]   ;;  %v512_v13 = vld [vmem:[%s677_s1 + $0x8] ss:$12 sps:$4 sm:$0xff]   ;;  %v362_v2 = vld [vmem:[%s678_s2 + $0x18] sm:$0xff] }
   0x6   :  { %487 = vmatprep.subr.bf16.mxu1 %v510_v11  ;;  %489 = vmatprep.mubr.msk.bf16.mxu1 %vm200_vm0, %v512_v13  ;;  %v514_v14 = vld [vmem:[%s677_s1 + $0x20] ss:$12 sps:$4 sm:$0xff]   ;;  %v508_v15 = vld [vmem:[%s676_s0 + $0x10] sm:$0xff]   ;;  %v519_v22 = vld [vmem:[%s677_s1 + $0x1c] ss:$12 sps:$4 sm:$0xff]  }
   0x7   :  { %456 = vmatpush3.bf16.msra.mxu0 %v499_v3  ;;  %v509_v16 = vld [vmem:[%s676_s0 + $0x48] sm:$0xff]   ;;  %v518_v17 = vld [vmem:[%s677_s1 + $0x4] ss:$12 sps:$4 sm:$0xff]  }
   0x8   :  { %457 = vmatprep.subr.bf16.mxu0 %v500_v4  ;;  %v511_v18 = vld [vmem:[%s676_s0 + $0x8] sm:$0xff]   ;;  %239 = vmatprep.mubr.bf16.mxu0 %v518_v17  ;;  %v513_v19 = vld [vmem:[%s676_s0 + $0x40] sm:$0xff]   ;;  %v361_v1 = vld [vmem:[%s678_s2 + $0x10] sm:$0xff] }
   0x9   :  { %488 = vmatpush3.bf16.msra.mxu1 %v510_v11  ;;  %v515_v20 = vld [vmem:[%s676_s0] sm:$0xff]   ;;  %v360_v0 = vld [vmem:[%s678_s2 + $0x8] sm:$0xff] }
   0xa   :  { %v516_v21 = vld [vmem:[%s677_s1] ss:$12 sps:$4 sm:$0xff]   ;;  %v521_v23 = vld [vmem:[%s677_s1 + $0x18] ss:$12 sps:$4 sm:$0xff]  }
   0xb   :  { %458 = vmatpush3.bf16.msra.mxu0 %v501_v5  ;;  %v359_v3 = vld [vmem:[%s678_s2] sm:$0xff]  ;;  %v388_v5 = vld [vmem:[%s679_s3 + $0x8] sm:$0xff] }
   0xc   :  { %459 = vmatprep.subr.bf16.mxu0 %v502_v6  ;;  %490 = vmatmul.mubr.msk.bf16.vlgmr.msra.gmra.mxu1 %vm200_vm0, %v514_v14  ;;  %v387_v4 = vld [vmem:[%s679_s3] sm:$0xff]  ;;  %v389_v6 = vld [vmem:[%s679_s3 + $0x10] sm:$0xff] }
   0xf   :  { %460 = vmatpush3.bf16.msra.mxu0 %v503_v7 }
  0x10   :  { %461 = vmatprep.subr.bf16.mxu0 %v504_v9 }
  0x13   :  { %462 = vmatpush3.bf16.msra.mxu0 %v505_v10 }
  0x14   :  { %463 = vmatprep.subr.bf16.mxu0 %v506_v12  ;;  %v390_v12 = vld [vmem:[%s679_s3 + $0x18] sm:$0xff] }
  0x17   :  { %464 = vmatpush3.bf16.msra.mxu0 %v508_v15 }
  0x18   :  { %465 = vmatprep.subr.bf16.mxu0 %v509_v16 }
  0x1b   :  { %466 = vmatpush3.bf16.msra.mxu0 %v511_v18 }
  0x1c   :  { %467 = vmatprep.subr.bf16.mxu0 %v513_v19 }
  0x1f   :  { %468 = vmatpush3.bf16.msra.mxu0 %v515_v20 }
  0x22   :  { %240 = vmatmul.mubr.bf16.vlgmr.msra.gmra.mxu0 %v516_v21 }
  0x23   :  { %247 = vmatprep.mubr.bf16.mxu0 %v519_v22 }
  0x2a   :  { %248 = vmatmul.mubr.bf16.gmra.mxu0 %v521_v23 }
  0xcc   :  { %v491_v24 = vpop.f32.mrf.mxu1 }
  0xce   :  { %v290_v25 = vpop.f32.mrf.mxu1 }
  0xd0   :  { %v492_v29 = vpop.f32.mrf.mxu1 }
  0xd2   :  { %v293_v35 = vpop.f32.mrf.mxu1 }
  0xe2   :  { %v469_v26 = vpop.f32.mrf.mxu0 }
  0xe4   :  { %v470_v27 = vpop.f32.mrf.mxu0 }
  0xe5   :  { %v471_v28 = vadd.f32 %v470_v27, %v469_v26 }
  0xe6   :  { %v472_v30 = vpop.f32.mrf.mxu0 }
  0xe7   :  { %v291_v31 = vadd.f32 %v471_v28, %v290_v25 }
  0xe8   :  { %v473_v32 = vpop.f32.mrf.mxu0 }
  0xe9   :  { %v474_v33 = vadd.f32 %v473_v32, %v472_v30  ;;  %v306_v34 = vsel %vm305_vm1, %v291_v31, 0.0 }
  0xea   :  { %v475_v36 = vpop.f32.mrf.mxu0  ;;  %307 = vadd.xlane.f32.xlu0 %v306_v34 }
  0xeb   :  { %v294_v37 = vadd.f32 %v474_v33, %v293_v35 }
  0xec   :  { %v476_v38 = vpop.f32.mrf.mxu0 }
  0xed   :  { %v477_v39 = vadd.f32 %v476_v38, %v475_v36  ;;  %v309_v40 = vsel %vm305_vm1, %v294_v37, 0.0 }
  0xee   :  { %v478_v41 = vpop.f32.mrf.mxu0  ;;  %310 = vadd.xlane.f32.xlu0 %v309_v40 }
  0xef   :  { %v299_v42 = vadd.f32 %v491_v24, %v477_v39 }
  0xf0   :  { %v479_v43 = vpop.f32.mrf.mxu0 }
  0xf1   :  { %v480_v44 = vadd.f32 %v479_v43, %v478_v41  ;;  %v312_v45 = vsel %vm305_vm1, %v299_v42, 0.0 }
  0xf2   :  { %313 = vadd.xlane.f32.xlu1 %v312_v45 }
  0xf3   :  { %v302_v46 = vadd.f32 %v492_v29, %v480_v44 }
  0xf5   :  { %v315_v47 = vsel %vm305_vm1, %v302_v46, 0.0 }
  0xf6   :  { %316 = vadd.xlane.f32.xlu1 %v315_v47 }
 0x173   :  { %v308_v49 = vpop.xlane.xlu0 %307 }
 0x174   :  { %v319_v50 = vmul.f32 0.125, %v308_v49 }
 0x176   :  { %v323_v51 = vsub.f32 %v291_v31, %v319_v50 }
 0x177   :  { %v311_v52 = vpop.xlane.xlu0 %310 }
 0x178   :  { %v320_v53 = vmul.f32 0.125, %v311_v52  ;;  %v327_v54 = vmul.f32 %v323_v51, %v323_v51 }
 0x17a   :  { %v324_v55 = vsub.f32 %v294_v37, %v320_v53  ;;  %v331_v56 = vsel %vm305_vm1, %v327_v54, 0.0 }
 0x17b   :  { %v314_v57 = vpop.xlane.xlu1 %313  ;;  %332 = vadd.xlane.f32.xlu0 %v331_v56 }
 0x17c   :  { %v321_v58 = vmul.f32 0.125, %v314_v57  ;;  %v328_v59 = vmul.f32 %v324_v55, %v324_v55 }
 0x17e   :  { %v325_v60 = vsub.f32 %v299_v42, %v321_v58  ;;  %v334_v61 = vsel %vm305_vm1, %v328_v59, 0.0 }
 0x17f   :  { %335 = vadd.xlane.f32.xlu1 %v334_v61  ;;  %v317_v7 = vpop.xlane.xlu1 %316 }
 0x180   :  { %v329_v62 = vmul.f32 %v325_v60, %v325_v60  ;;  %v322_v8 = vmul.f32 0.125, %v317_v7 }
 0x182   :  { %v337_v63 = vsel %vm305_vm1, %v329_v62, 0.0  ;;  %v326_v9 = vsub.f32 %v302_v46, %v322_v8 }
 0x183   :  { %338 = vadd.xlane.f32.xlu0 %v337_v63 }
 0x184   :  { %v330_v10 = vmul.f32 %v326_v9, %v326_v9 }
 0x186   :  { %v340_v11 = vsel %vm305_vm1, %v330_v10, 0.0 }
 0x190   :  { %370 = vperm.xlu1 %495, %v360_v0  }
 0x194   :  { %375 = vperm.xlu1 %495, %v361_v1  }
 0x198   :  { %380 = vperm.xlu1 %495, %v362_v2  }
 0x199   :  { %365 = vperm.xlu0 %494, %v359_v3  }
 0x19c   :  { %393 = vperm.xlu1 %495, %v387_v4  }
 0x1a0   :  { %398 = vperm.xlu1 %495, %v388_v5  }
 0x1a4   :  { %403 = vperm.xlu1 %495, %v389_v6  }
 0x1c8   :  { %341 = vadd.xlane.f32.xlu1 %v340_v11 }
 0x1d9   :  { %408 = vperm.xlu1 %495, %v390_v12  }
 0x204   :  { %v333_v13 = vpop.xlane.xlu0 %332 }
 0x205   :  { %v343_v14 = vmul.f32 0.125, %v333_v13 }
 0x207   :  { %v347_v15 = vadd.f32 1e-05, %v343_v14 }
 0x208   :  { %v336_v16 = vpop.xlane.xlu1 %335 }
 0x209   :  { %522 = vrsqrt.f32 %v347_v15  ;;  %v344_v17 = vmul.f32 0.125, %v336_v16 }
 0x20b   :  { %v348_v18 = vadd.f32 1e-05, %v344_v17 }
 0x20c   :  { %v371_v19 = vpop.permute.xlu1 %370  ;;  %v339_v20 = vpop.xlane.xlu0 %338 }
 0x20d   :  { %524 = vrsqrt.f32 %v348_v18  ;;  %v345_v21 = vmul.f32 0.125, %v339_v20 }
 0x20f   :  { %v349_v22 = vadd.f32 1e-05, %v345_v21 }
 0x210   :  { %v376_v23 = vpop.permute.xlu1 %375 }
 0x211   :  { %526 = vrsqrt.f32 %v349_v22 }
 0x214   :  { %v381_v24 = vpop.permute.xlu1 %380  ;;  %v366_v26 = vpop.permute.xlu0 %365 }
 0x216   :  { %v523_v25 = vpop.eup %522 }
 0x217   :  { %v355_v27 = vmul.f32 %v523_v25, %v323_v51 }
 0x218   :  { %v394_v28 = vpop.permute.xlu1 %393 }
 0x219   :  { %v383_v29 = vmul.f32 %v366_v26, %v355_v27 }
 0x21a   :  { %v525_v30 = vpop.eup %524 }
 0x21b   :  { %v356_v31 = vmul.f32 %v525_v30, %v324_v55  ;;  %v411_v32 = vadd.f32 %v394_v28, %v383_v29 }
 0x21c   :  { %v399_v33 = vpop.permute.xlu1 %398 }
 0x21d   :  { %v384_v34 = vmul.f32 %v371_v19, %v356_v31  ;;  %v415_v35 = vmax.f32 %v411_v32, 0.0 }
 0x21e   :  { %v527_v36 = vpop.eup %526 }
 0x21f   :  { %v357_v37 = vmul.f32 %v527_v36, %v325_v60  ;;  %419 = vst.msk [vmem:[%s680_s4] sm:$0xff] %vm305_vm1, %v415_v35  ;;  %v412_v38 = vadd.f32 %v399_v33, %v384_v34 }
 0x220   :  { %v404_v41 = vpop.permute.xlu1 %403 }
 0x221   :  { %v385_v39 = vmul.f32 %v376_v23, %v357_v37  ;;  %v416_v40 = vmax.f32 %v412_v38, 0.0 }
 0x223   :  { %420 = vst.msk [vmem:[%s680_s4 + $0x8] sm:$0xff] %vm305_vm1, %v416_v40  ;;  %v413_v42 = vadd.f32 %v404_v41, %v385_v39 }
 0x225   :  { %v417_v43 = vmax.f32 %v413_v42, 0.0 }
 0x227   :  { %421 = vst.msk [vmem:[%s680_s4 + $0x10] sm:$0xff] %vm305_vm1, %v417_v43 }
 0x251   :  { %v342_v44 = vpop.xlane.xlu1 %341 }
 0x252   :  { %v346_v45 = vmul.f32 0.125, %v342_v44 }
 0x254   :  { %v350_v46 = vadd.f32 1e-05, %v346_v45 }
 0x255   :  { %v409_v50 = vpop.permute.xlu1 %408 }
 0x256   :  { %528 = vrsqrt.f32 %v350_v46 }
 0x263   :  { %v529_v47 = vpop.eup %528 }
 0x264   :  { %v358_v48 = vmul.f32 %v529_v47, %v326_v9 }
 0x266   :  { %v386_v49 = vmul.f32 %v381_v24, %v358_v48 }
 0x268   :  { %v414_v51 = vadd.f32 %v409_v50, %v386_v49 }
 0x26a   :  { %v418_v52 = vmax.f32 %v414_v51, 0.0 }
 0x26c   :  { %422 = vst.msk [vmem:[%s680_s4 + $0x18] sm:$0xff] %vm305_vm1, %v418_v52 }

// kernel: generator_forward.18
= control target key start
LH: loop header
LB: loop body
LE: loop exit
PB: predicated region body
PF: predicated region fallthrough
CT: control target
= control target key end

     0   :  { %vm203_vm0 = vcmask 261120   ;;  %vm308_vm1 = vcmask 64512   ;;  %v537_v48 = vmov 0   ;;  %s700_s0 = inlined_call_operand.vmem [shape: bf16[1,288,8], index: 0, kind: input, shape index: {}]   ;;  %s701_s1 = inlined_call_operand.vmem [shape: bf16[32,288], index: 1, kind: input, shape index: {}]   ;;  %s702_s2 = inlined_call_operand.vmem [shape: f32[32,1], index: 2, kind: input, shape index: {}]   ;;  %s703_s3 = inlined_call_operand.vmem [shape: f32[32,1], index: 3, kind: input, shape index: {}]   ;;  %s704_s4 = inlined_call_operand.vmem [shape: f32[1,32,8], index: 4, kind: input, shape index: {}]   ;;  %s705_s5 = inlined_call_operand.vmem [shape: f32[1,32,8], index: 5, kind: output, shape index: {}]  }
   0x1   :  { %v503_v0 = vld [vmem:[%s700_s0 + $0x78] sm:$0xff]   ;;  %v505_v2 = vld [vmem:[%s700_s0 + $0x70] sm:$0xff]   ;;  %v507_v4 = vld [vmem:[%s700_s0 + $0x68] sm:$0xff]   ;;  %502 = vset.pattern.permute.xlu1 %v537_v48  ;;  %501 = vset.pattern.permute.xlu0 %v537_v48 }
   0x2   :  { %v504_v1 = vld [vmem:[%s700_s0 + $0x38] sm:$0xff]   ;;  %460 = vmatprep.subr.bf16.mxu0 %v503_v0  ;;  %v506_v3 = vld [vmem:[%s700_s0 + $0x30] sm:$0xff]   ;;  %v508_v5 = vld [vmem:[%s700_s0 + $0x28] sm:$0xff]  }
   0x3   :  { %461 = vmatpush3.bf16.msra.mxu0 %v504_v1  ;;  %v509_v6 = vld [vmem:[%s700_s0 + $0x60] sm:$0xff]   ;;  %v514_v8 = vld [vmem:[%s700_s0 + $0x88] sm:$0xff]   ;;  %v511_v9 = vld [vmem:[%s700_s0 + $0x58] sm:$0xff]  }
   0x4   :  { %462 = vmatprep.subr.bf16.mxu0 %v505_v2  ;;  %v510_v7 = vld [vmem:[%s700_s0 + $0x20] sm:$0xff]   ;;  %v512_v10 = vld [vmem:[%s700_s0 + $0x18] sm:$0xff]   ;;  %492 = vmatprep.subr.bf16.mxu1 %v514_v8  ;;  %v513_v12 = vld [vmem:[%s700_s0 + $0x50] sm:$0xff]  }
   0x5   :  { %493 = vmatpush3.bf16.msra.mxu1 %v514_v8  ;;  %v517_v11 = vld [vmem:[%s700_s0 + $0x80] sm:$0xff]   ;;  %v519_v13 = vld [vmem:[%s701_s1 + $0x8] ss:$12 sps:$4 sm:$0xff]   ;;  %v365_v2 = vld [vmem:[%s702_s2 + $0x18] sm:$0xff] }
   0x6   :  { %494 = vmatprep.subr.bf16.mxu1 %v517_v11  ;;  %496 = vmatprep.mubr.msk.bf16.mxu1 %vm203_vm0, %v519_v13  ;;  %v521_v14 = vld [vmem:[%s701_s1 + $0x20] ss:$12 sps:$4 sm:$0xff]   ;;  %v515_v15 = vld [vmem:[%s700_s0 + $0x10] sm:$0xff]   ;;  %v526_v22 = vld [vmem:[%s701_s1 + $0x1c] ss:$12 sps:$4 sm:$0xff]  }
   0x7   :  { %463 = vmatpush3.bf16.msra.mxu0 %v506_v3  ;;  %v516_v16 = vld [vmem:[%s700_s0 + $0x48] sm:$0xff]   ;;  %v525_v17 = vld [vmem:[%s701_s1 + $0x4] ss:$12 sps:$4 sm:$0xff]  }
   0x8   :  { %464 = vmatprep.subr.bf16.mxu0 %v507_v4  ;;  %v518_v18 = vld [vmem:[%s700_s0 + $0x8] sm:$0xff]   ;;  %242 = vmatprep.mubr.bf16.mxu0 %v525_v17  ;;  %v520_v19 = vld [vmem:[%s700_s0 + $0x40] sm:$0xff]   ;;  %v364_v1 = vld [vmem:[%s702_s2 + $0x10] sm:$0xff] }
   0x9   :  { %495 = vmatpush3.bf16.msra.mxu1 %v517_v11  ;;  %v522_v20 = vld [vmem:[%s700_s0] sm:$0xff]   ;;  %v363_v0 = vld [vmem:[%s702_s2 + $0x8] sm:$0xff] }
   0xa   :  { %v523_v21 = vld [vmem:[%s701_s1] ss:$12 sps:$4 sm:$0xff]   ;;  %v528_v23 = vld [vmem:[%s701_s1 + $0x18] ss:$12 sps:$4 sm:$0xff]  }
   0xb   :  { %465 = vmatpush3.bf16.msra.mxu0 %v508_v5  ;;  %v362_v3 = vld [vmem:[%s702_s2] sm:$0xff]  ;;  %v391_v5 = vld [vmem:[%s703_s3 + $0x8] sm:$0xff] }
   0xc   :  { %466 = vmatprep.subr.bf16.mxu0 %v509_v6  ;;  %497 = vmatmul.mubr.msk.bf16.vlgmr.msra.gmra.mxu1 %vm203_vm0, %v521_v14  ;;  %v390_v4 = vld [vmem:[%s703_s3] sm:$0xff]  ;;  %v392_v6 = vld [vmem:[%s703_s3 + $0x10] sm:$0xff] }
   0xf   :  { %467 = vmatpush3.bf16.msra.mxu0 %v510_v7 }
  0x10   :  { %468 = vmatprep.subr.bf16.mxu0 %v511_v9 }
  0x13   :  { %469 = vmatpush3.bf16.msra.mxu0 %v512_v10 }
  0x14   :  { %470 = vmatprep.subr.bf16.mxu0 %v513_v12  ;;  %v393_v12 = vld [vmem:[%s703_s3 + $0x18] sm:$0xff] }
  0x17   :  { %471 = vmatpush3.bf16.msra.mxu0 %v515_v15 }
  0x18   :  { %472 = vmatprep.subr.bf16.mxu0 %v516_v16 }
  0x1b   :  { %473 = vmatpush3.bf16.msra.mxu0 %v518_v18 }
  0x1c   :  { %474 = vmatprep.subr.bf16.mxu0 %v520_v19 }
  0x1f   :  { %475 = vmatpush3.bf16.msra.mxu0 %v522_v20 }
  0x22   :  { %243 = vmatmul.mubr.bf16.vlgmr.msra.gmra.mxu0 %v523_v21 }
  0x23   :  { %250 = vmatprep.mubr.bf16.mxu0 %v526_v22 }
  0x2a   :  { %251 = vmatmul.mubr.bf16.gmra.mxu0 %v528_v23 }
  0xcc   :  { %v498_v24 = vpop.f32.mrf.mxu1 }
  0xce   :  { %v293_v25 = vpop.f32.mrf.mxu1 }
  0xd0   :  { %v499_v29 = vpop.f32.mrf.mxu1 }
  0xd2   :  { %v296_v35 = vpop.f32.mrf.mxu1 }
  0xe2   :  { %v476_v26 = vpop.f32.mrf.mxu0 }
  0xe4   :  { %v477_v27 = vpop.f32.mrf.mxu0 }
  0xe5   :  { %v478_v28 = vadd.f32 %v477_v27, %v476_v26 }
  0xe6   :  { %v479_v30 = vpop.f32.mrf.mxu0 }
  0xe7   :  { %v294_v31 = vadd.f32 %v478_v28, %v293_v25 }
  0xe8   :  { %v480_v32 = vpop.f32.mrf.mxu0 }
  0xe9   :  { %v481_v33 = vadd.f32 %v480_v32, %v479_v30  ;;  %v309_v34 = vsel %vm308_vm1, %v294_v31, 0.0 }
  0xea   :  { %v482_v36 = vpop.f32.mrf.mxu0  ;;  %310 = vadd.xlane.f32.xlu0 %v309_v34 }
  0xeb   :  { %v297_v37 = vadd.f32 %v481_v33, %v296_v35 }
  0xec   :  { %v483_v38 = vpop.f32.mrf.mxu0 }
  0xed   :  { %v484_v39 = vadd.f32 %v483_v38, %v482_v36  ;;  %v312_v40 = vsel %vm308_vm1, %v297_v37, 0.0  ;;  %v419_v38 = vld [vmem:[%s704_s4 + $0x8] sm:$0xff] }
  0xee   :  { %v485_v41 = vpop.f32.mrf.mxu0  ;;  %313 = vadd.xlane.f32.xlu0 %v312_v40 }
  0xef   :  { %v302_v42 = vadd.f32 %v498_v24, %v484_v39 }
  0xf0   :  { %v486_v43 = vpop.f32.mrf.mxu0 }
  0xf1   :  { %v487_v44 = vadd.f32 %v486_v43, %v485_v41  ;;  %v315_v45 = vsel %vm308_vm1, %v302_v42, 0.0  ;;  %v420_v43 = vld [vmem:[%s704_s4 + $0x10] sm:$0xff] }
  0xf2   :  { %316 = vadd.xlane.f32.xlu1 %v315_v45 }
  0xf3   :  { %v305_v46 = vadd.f32 %v499_v29, %v487_v44 }
  0xf5   :  { %v318_v47 = vsel %vm308_vm1, %v305_v46, 0.0 }
  0xf6   :  { %319 = vadd.xlane.f32.xlu1 %v318_v47 }
 0x173   :  { %v311_v49 = vpop.xlane.xlu0 %310 }
 0x174   :  { %v322_v50 = vmul.f32 0.125, %v311_v49 }
 0x176   :  { %v326_v51 = vsub.f32 %v294_v31, %v322_v50  ;;  %v418_v31 = vld [vmem:[%s704_s4] sm:$0xff] }
 0x177   :  { %v314_v52 = vpop.xlane.xlu0 %313 }
 0x178   :  { %v323_v53 = vmul.f32 0.125, %v314_v52  ;;  %v330_v54 = vmul.f32 %v326_v51, %v326_v51 }
 0x17a   :  { %v327_v55 = vsub.f32 %v297_v37, %v323_v53  ;;  %v334_v56 = vsel %vm308_vm1, %v330_v54, 0.0  ;;  %v421_v53 = vld [vmem:[%s704_s4 + $0x18] sm:$0xff] }
 0x17b   :  { %v317_v57 = vpop.xlane.xlu1 %316  ;;  %335 = vadd.xlane.f32.xlu0 %v334_v56 }
 0x17c   :  { %v324_v58 = vmul.f32 0.125, %v317_v57  ;;  %v331_v59 = vmul.f32 %v327_v55, %v327_v55 }
 0x17e   :  { %v328_v60 = vsub.f32 %v302_v42, %v324_v58  ;;  %v337_v61 = vsel %vm308_vm1, %v331_v59, 0.0 }
 0x17f   :  { %338 = vadd.xlane.f32.xlu1 %v337_v61  ;;  %v320_v7 = vpop.xlane.xlu1 %319 }
 0x180   :  { %v332_v62 = vmul.f32 %v328_v60, %v328_v60  ;;  %v325_v8 = vmul.f32 0.125, %v320_v7 }
 0x182   :  { %v340_v63 = vsel %vm308_vm1, %v332_v62, 0.0  ;;  %v329_v9 = vsub.f32 %v305_v46, %v325_v8 }
 0x183   :  { %341 = vadd.xlane.f32.xlu0 %v340_v63 }
 0x184   :  { %v333_v10 = vmul.f32 %v329_v9, %v329_v9 }
 0x186   :  { %v343_v11 = vsel %vm308_vm1, %v333_v10, 0.0 }
 0x190   :  { %373 = vperm.xlu1 %502, %v363_v0  }
 0x194   :  { %378 = vperm.xlu1 %502, %v364_v1  }
 0x198   :  { %383 = vperm.xlu1 %502, %v365_v2  }
 0x199   :  { %368 = vperm.xlu0 %501, %v362_v3  }
 0x19c   :  { %396 = vperm.xlu1 %502, %v390_v4  }
 0x1a0   :  { %401 = vperm.xlu1 %502, %v391_v5  }
 0x1a4   :  { %406 = vperm.xlu1 %502, %v392_v6  }
 0x1c8   :  { %344 = vadd.xlane.f32.xlu1 %v343_v11 }
 0x1d9   :  { %411 = vperm.xlu1 %502, %v393_v12  }
 0x204   :  { %v336_v13 = vpop.xlane.xlu0 %335 }
 0x205   :  { %v346_v14 = vmul.f32 0.125, %v336_v13 }
 0x207   :  { %v350_v15 = vadd.f32 1e-05, %v346_v14 }
 0x208   :  { %v339_v16 = vpop.xlane.xlu1 %338 }
 0x209   :  { %529 = vrsqrt.f32 %v350_v15  ;;  %v347_v17 = vmul.f32 0.125, %v339_v16 }
 0x20b   :  { %v351_v18 = vadd.f32 1e-05, %v347_v17 }
 0x20c   :  { %v374_v19 = vpop.permute.xlu1 %373  ;;  %v342_v20 = vpop.xlane.xlu0 %341 }
 0x20d   :  { %531 = vrsqrt.f32 %v351_v18  ;;  %v348_v21 = vmul.f32 0.125, %v342_v20 }
 0x20f   :  { %v352_v22 = vadd.f32 1e-05, %v348_v21 }
 0x210   :  { %v379_v23 = vpop.permute.xlu1 %378 }
 0x211   :  { %533 = vrsqrt.f32 %v352_v22 }
 0x214   :  { %v384_v24 = vpop.permute.xlu1 %383  ;;  %v369_v26 = vpop.permute.xlu0 %368 }
 0x216   :  { %v530_v25 = vpop.eup %529 }
 0x217   :  { %v358_v27 = vmul.f32 %v530_v25, %v326_v51 }
 0x218   :  { %v397_v28 = vpop.permute.xlu1 %396 }
 0x219   :  { %v386_v29 = vmul.f32 %v369_v26, %v358_v27 }
 0x21a   :  { %v532_v30 = vpop.eup %531 }
 0x21b   :  { %v359_v32 = vmul.f32 %v532_v30, %v327_v55  ;;  %v414_v33 = vadd.f32 %v397_v28, %v386_v29 }
 0x21c   :  { %v402_v34 = vpop.permute.xlu1 %401 }
 0x21d   :  { %v387_v35 = vmul.f32 %v374_v19, %v359_v32  ;;  %v422_v36 = vadd.f32 %v418_v31, %v414_v33 }
 0x21e   :  { %v534_v37 = vpop.eup %533 }
 0x21f   :  { %v360_v39 = vmul.f32 %v534_v37, %v328_v60  ;;  %426 = vst.msk [vmem:[%s705_s5] sm:$0xff] %vm308_vm1, %v422_v36  ;;  %v415_v40 = vadd.f32 %v402_v34, %v387_v35 }
 0x220   :  { %v407_v44 = vpop.permute.xlu1 %406 }
 0x221   :  { %v388_v41 = vmul.f32 %v379_v23, %v360_v39  ;;  %v423_v42 = vadd.f32 %v419_v38, %v415_v40 }
 0x223   :  { %427 = vst.msk [vmem:[%s705_s5 + $0x8] sm:$0xff] %vm308_vm1, %v423_v42  ;;  %v416_v45 = vadd.f32 %v407_v44, %v388_v41 }
 0x225   :  { %v424_v46 = vadd.f32 %v420_v43, %v416_v45 }
 0x227   :  { %428 = vst.msk [vmem:[%s705_s5 + $0x10] sm:$0xff] %vm308_vm1, %v424_v46 }
 0x251   :  { %v345_v47 = vpop.xlane.xlu1 %344 }
 0x252   :  { %v349_v48 = vmul.f32 0.125, %v345_v47 }
 0x254   :  { %v353_v49 = vadd.f32 1e-05, %v349_v48 }
 0x255   :  { %v412_v54 = vpop.permute.xlu1 %411 }
 0x256   :  { %535 = vrsqrt.f32 %v353_v49 }
 0x263   :  { %v536_v50 = vpop.eup %535 }
 0x264   :  { %v361_v51 = vmul.f32 %v536_v50, %v329_v9 }
 0x266   :  { %v389_v52 = vmul.f32 %v384_v24, %v361_v51 }
 0x268   :  { %v417_v55 = vadd.f32 %v412_v54, %v389_v52 }
 0x26a   :  { %v425_v56 = vadd.f32 %v421_v53, %v417_v55 }
 0x26c   :  { %429 = vst.msk [vmem:[%s705_s5 + $0x18] sm:$0xff] %vm308_vm1, %v425_v56 }

// kernel: generator_forward.25
= control target key start
LH: loop header
LB: loop body
LE: loop exit
PB: predicated region body
PF: predicated region fallthrough
CT: control target
= control target key end

     0   :  { %s609_s9 = smov 0   ;;  %s665_s0 = inlined_call_operand.vmem [shape: bf16[2,288,25], index: 0, kind: input, shape index: {}]   ;;  %s666_s1 = inlined_call_operand.vmem [shape: bf16[16,288], index: 1, kind: input, shape index: {}]   ;;  %s667_s2 = inlined_call_operand.vmem [shape: f32[2,16,25], index: 2, kind: output, shape index: {}]  }
   0x1 LB: > { %s481_s10 = sadd.s32 4294967295, %s590_s9   ;;  %p485_p0 = scmp.ge.s32.totalorder %s590_s9, 1  ;;  %s590_s9 = sphi %s609_s9, %s12_s9  }
   0x2   : > { %p112_p1 = scmp.lt.s32.totalorder %s590_s9, 3 }
   0x4   : > { %p113_p2 = pnand %p485_p0, %p112_p1 }
   0x5   : > { %p134_p3 = scmp.lt.s32.totalorder (!%p113_p2), %s481_s10, 1 }
   0x6   : > { %116 = sbr.rel (%p113_p2) target bundleno = 558 (0x22e), region = 28 }
   0xb   : > { %v592_v0 = vmov 0.0   ;;  %vm593_vm0 = vmmov 0   ;;  %s669_s10 = smov (!%p134_p3, %s481_s10), 1  ;;  %v579_v1 = vld [vmem:[%s666_s1 + $0x4] ss:$12 sps:$4 sm:$0xff]   ;;  %vm308_vm1 = vcmask 261120  }
   0xc   : > { %539 = vmatprep.subr.bf16.mxu1 %v592_v0  ;;  %543 = vmatprep.mubr.msk.bf16.mxu1 %vm593_vm0, %v592_v0  ;;  %s547_s13 = smul.u32 144, %s669_s10  ;;  %v576_v15 = vld [vmem:[%s666_s1 + $0x8] ss:$12 sps:$4 sm:$0xff]   ;;  %v577_v21 = vld [vmem:[%s666_s1] ss:$12 sps:$4 sm:$0xff]   ;;  %vm394_vm2 = vcmask 203776  }
   0xd   : > { %344 = vmatprep.mubr.bf16.mxu0 %v579_v1  ;;  %s513_s21 = sshll.u32 %s669_s10, 4 }
   0xe   : > { %s626_s16 = scalar_lea.vmem %s665_s0, %s547_s13  ;;  %s143_s24 = scalar_lea.vmem %s667_s2, %s513_s21 }
   0xf   : > { %v558_v2 = vld [vmem:[%s626_s16 + $0x78] sm:$0xff]   ;;  %v560_v4 = vld [vmem:[%s626_s16 + $0x70] sm:$0xff]   ;;  %v562_v6 = vld [vmem:[%s626_s16 + $0x68] sm:$0xff]  }
  0x10   : > { %v559_v3 = vld [vmem:[%s626_s16 + $0x38] sm:$0xff]   ;;  %514 = vmatprep.subr.bf16.mxu0 %v558_v2  ;;  %v561_v5 = vld [vmem:[%s626_s16 + $0x30] sm:$0xff]   ;;  %v563_v7 = vld [vmem:[%s626_s16 + $0x28] sm:$0xff]  }
  0x11   : > { %515 = vmatpush3.bf16.msra.mxu0 %v559_v3  ;;  %v564_v8 = vld [vmem:[%s626_s16 + $0x60] sm:$0xff]   ;;  %v566_v10 = vld [vmem:[%s626_s16 + $0x58] sm:$0xff]   ;;  %v570_v11 = vld [vmem:[%s626_s16 + $0x88] sm:$0xff]  }
  0x12   : > { %516 = vmatprep.subr.bf16.mxu0 %v560_v4  ;;  %v565_v9 = vld [vmem:[%s626_s16 + $0x20] sm:$0xff]   ;;  %v567_v12 = vld [vmem:[%s626_s16 + $0x18] sm:$0xff]   ;;  %540 = vmatpush3.bf16.msra.mxu1 %v570_v11  ;;  %v568_v14 = vld [vmem:[%s626_s16 + $0x50] sm:$0xff]  }
  0x13   : > { %541 = vmatprep.subr.bf16.mxu1 %v592_v0  ;;  %v573_v13 = vld [vmem:[%s626_s16 + $0x80] sm:$0xff]   ;;  %v569_v16 = vld [vmem:[%s626_s16 + $0x10] sm:$0xff]   ;;  %v571_v17 = vld [vmem:[%s626_s16 + $0x48] sm:$0xff]  }
  0x14   : > { %v572_v18 = vld [vmem:[%s626_s16 + $0x8] sm:$0xff]   ;;  %v574_v19 = vld [vmem:[%s626_s16 + $0x40] sm:$0xff]  }
  0x15   : > { %517 = vmatpush3.bf16.msra.mxu0 %v561_v5  ;;  %v575_v20 = vld [vmem:[%s626_s16] sm:$0xff]  }
  0x16   : > { %518 = vmatprep.subr.bf16.mxu0 %v562_v6  ;;  %542 = vmatpush3.bf16.msra.mxu1 %v573_v13 }
  0x19   : > { %519 = vmatpush3.bf16.msra.mxu0 %v563_v7  ;;  %544 = vmatmul.mubr.msk.bf16.vlgmr.msra.gmra.mxu1 %vm308_vm1, %v576_v15 }
  0x1a   : > { %520 = vmatprep.subr.bf16.mxu0 %v564_v8 }
  0x1d   : > { %521 = vmatpush3.bf16.msra.mxu0 %v565_v9 }
  0x1e   : > { %522 = vmatprep.subr.bf16.mxu0 %v566_v10 }
  0x21   : > { %523 = vmatpush3.bf16.msra.mxu0 %v567_v12 }
  0x22   : > { %524 = vmatprep.subr.bf16.mxu0 %v568_v14 }
  0x25   : > { %525 = vmatpush3.bf16.msra.mxu0 %v569_v16 }
  0x26   : > { %526 = vmatprep.subr.bf16.mxu0 %v571_v17 }
  0x29   : > { %527 = vmatpush3.bf16.msra.mxu0 %v572_v18 }
  0x2a   : > { %528 = vmatprep.subr.bf16.mxu0 %v574_v19 }
  0x2d   : > { %529 = vmatpush3.bf16.msra.mxu0 %v575_v20 }
  0x30   : > { %345 = vmatmul.mubr.bf16.vlgmr.msra.gmra.mxu0 %v577_v21 }
  0xd9   : > { %v387_v22 = vpop.f32.mrf.mxu1 }
  0xdb   : > { %v545_v23 = vpop.f32.mrf.mxu1 }
  0xdd   : > { %v390_v24 = vpop.f32.mrf.mxu1 }
  0xdf   : > { %v546_v25 = vpop.f32.mrf.mxu1 }
  0xf0   : > { %v530_v26 = vpop.f32.mrf.mxu0 }
  0xf2   : > { %v531_v27 = vpop.f32.mrf.mxu0 }
  0xf3   : > { %v532_v28 = vadd.f32 %v531_v27, %v530_v26 }
  0xf4   : > { %v533_v29 = vpop.f32.mrf.mxu0 }
  0xf5   : > { %v388_v30 = vadd.f32 %v532_v28, %v387_v22 }
  0xf6   : > { %v534_v31 = vpop.f32.mrf.mxu0 }
  0xf7   : > { %v535_v32 = vadd.f32 %v534_v31, %v533_v29  ;;  %v395_v33 = vsel %vm394_vm2, %v388_v30, 0.0 }
  0xf8   : > { %396 = vadd.xlane.f32.xlu0 %v395_v33 }
  0xf9   : > { %v391_v34 = vadd.f32 %v535_v32, %v390_v24 }
  0xfb   : > { %v398_v35 = vsel %vm394_vm2, %v391_v34, 0.0 }
  0xfc   : > { %399 = vadd.xlane.f32.xlu0 %v398_v35 }
 0x181   : > { %v397_v36 = vpop.xlane.xlu0 %396 }
 0x182   : > { %v402_v37 = vmul.f32 0.04, %v397_v36 }
 0x184   : > { %v404_v38 = vsub.f32 %v388_v30, %v402_v37 }
 0x185   : > { %v400_v39 = vpop.xlane.xlu0 %399 }
 0x186   : > { %v403_v40 = vmul.f32 0.04, %v400_v39  ;;  %v406_v41 = vmul.f32 %v404_v38, %v404_v38 }
 0x188   : > { %v405_v42 = vsub.f32 %v391_v34, %v403_v40  ;;  %v408_v43 = vsel %vm394_vm2, %v406_v41, 0.0 }
 0x189   : > { %409 = vadd.xlane.f32.xlu1 %v408_v43 }
 0x18a   : > { %v407_v44 = vmul.f32 %v405_v42, %v405_v42 }
 0x18c   : > { %v411_v45 = vsel %vm394_vm2, %v407_v44, 0.0 }
 0x18d   : > { %412 = vadd.xlane.f32.xlu1 %v411_v45 }
 0x212   : > { %v410_v46 = vpop.xlane.xlu1 %409 }
 0x213   : > { %v414_v47 = vmul.f32 0.04, %v410_v46 }
 0x215   : > { %v416_v48 = vadd.f32 1e-05, %v414_v47 }
 0x216   : > { %v413_v49 = vpop.xlane.xlu1 %412 }
 0x217   : > { %580 = vrsqrt.f32 %v416_v48  ;;  %v415_v50 = vmul.f32 0.04, %v413_v49 }
 0x219   : > { %v417_v51 = vadd.f32 1e-05, %v415_v50 }
 0x21b   : > { %582 = vrsqrt.f32 %v417_v51 }
 0x224   : > { %v581_v52 = vpop.eup %580 }
 0x225   : > { %v420_v53 = vmul.f32 %v581_v52, %v404_v38 }
 0x227   : > { %v422_v54 = vmax.f32 %v420_v53, 0.0 }
 0x228   : > { %v583_v55 = vpop.eup %582 }
 0x229   : > { %424 = vst.msk [vmem:[%s143_s24] sm:$0xff] %vm394_vm2, %v422_v54  ;;  %v421_v56 = vmul.f32 %v583_v55, %v405_v42 }
 0x22b   : > { %v423_v57 = vmax.f32 %v421_v56, 0.0 }
 0x22d   : > { %425 = vst.msk [vmem:[%s143_s24 + $0x8] sm:$0xff] %vm394_vm2, %v423_v57 }
 0x22e PF: > { %s12_s9 = sadd.s32 1, %s590_s9  }
 0x22f   : > { %p9_p4 = scmp.ge.s32.totalorder %s12_s9, 4  }
 0x231   :  { %11 = sbr.rel (!%p9_p4) target bundleno = 1 (0x1), region = 58 }

// kernel: generator_forward.26
= control target key start
LH: loop header
LB: loop body
LE: loop exit
PB: predicated region body
PF: predicated region fallthrough
CT: control target
= control target key end

     0   :  { %s404_s9 = smov 0   ;;  %s431_s0 = inlined_call_operand.vmem [shape: bf16[2,144,121], index: 0, kind: input, shape index: {}]   ;;  %s432_s1 = inlined_call_operand.vmem [shape: bf16[8,144], index: 1, kind: input, shape index: {}]   ;;  %s433_s2 = inlined_call_operand.vmem [shape: f32[2,8,121], index: 2, kind: output, shape index: {}]  }
   0x1 LB: > { %s336_s10 = sadd.s32 4294967295, %s386_s9   ;;  %p340_p0 = scmp.ge.s32.totalorder %s386_s9, 1  ;;  %s386_s9 = sphi %s404_s9, %s12_s9  }
   0x2   : > { %p112_p1 = scmp.lt.s32.totalorder %s386_s9, 3 }
   0x4   : > { %p113_p2 = pnand %p340_p0, %p112_p1 }
   0x5   : > { %p133_p3 = scmp.lt.s32.totalorder (!%p113_p2), %s336_s10, 1 }
   0x6   : > { %116 = sbr.rel (%p113_p2) target bundleno = 551 (0x227), region = 28 }
   0xb   : > { %v143_v0 = vld [vmem:[%s432_s1] sm:$0xff]  ;;  %vm222_vm0 = vcmask 130048   ;;  %v388_v1 = vmov 0   ;;  %s435_s10 = smov (!%p133_p3, %s336_s10), 1  ;;  %vm266_vm1 = vcmask 990208  }
   0xc   : > { %226 = vmatprep.subr.bf16.mxu0 %v388_v1  ;;  %v344_v2 = vcombine.high %v143_v0, %v143_v0  ;;  %s357_s13 = smul.u32 72, %s435_s10  ;;  %v343_v12 = vcombine.low %v143_v0, %v143_v0  ;;  %s342_s17 = sshll.u32 %s435_s10, 3 }
   0xd   : > { %s141_s20 = scalar_lea.vmem %s433_s2, %s342_s17 }
   0xe   : > { %354 = vmatprep.mubr.msk.bf16.mxu0 %vm222_vm0, %v344_v2  ;;  %s137_s16 = scalar_lea.vmem %s431_s0, %s357_s13 }
   0xf   : > { %v367_v3 = vld [vmem:[%s137_s16 + $0x38] sm:$0xff]   ;;  %v368_v4 = vld [vmem:[%s137_s16 + $0x30] sm:$0xff]   ;;  %v369_v5 = vld [vmem:[%s137_s16 + $0x28] sm:$0xff]  }
  0x10   : > { %227 = vmatpush1.bf16.msra.mxu0 %v367_v3  ;;  %v370_v6 = vld [vmem:[%s137_s16 + $0x20] sm:$0xff]   ;;  %v371_v7 = vld [vmem:[%s137_s16 + $0x18] sm:$0xff]   ;;  %v372_v8 = vld [vmem:[%s137_s16 + $0x10] sm:$0xff]  }
  0x11   : > { %228 = vmatprep.subr.bf16.mxu0 %v388_v1  ;;  %v373_v9 = vld [vmem:[%s137_s16 + $0x8] sm:$0xff]   ;;  %v374_v10 = vld [vmem:[%s137_s16] sm:$0xff]  }
  0x12   : > { %v375_v11 = vld [vmem:[%s137_s16 + $0x40] sm:$0xff]  }
  0x14   : > { %229 = vmatpush1.bf16.msra.mxu0 %v368_v4 }
  0x15   : > { %230 = vmatprep.subr.bf16.mxu0 %v388_v1 }
  0x18   : > { %231 = vmatpush1.bf16.msra.mxu0 %v369_v5 }
  0x19   : > { %232 = vmatprep.subr.bf16.mxu0 %v388_v1 }
  0x1c   : > { %233 = vmatpush1.bf16.msra.mxu0 %v370_v6 }
  0x1d   : > { %234 = vmatprep.subr.bf16.mxu0 %v388_v1 }
  0x20   : > { %235 = vmatpush1.bf16.msra.mxu0 %v371_v7 }
  0x21   : > { %236 = vmatprep.subr.bf16.mxu0 %v388_v1 }
  0x24   : > { %237 = vmatpush1.bf16.msra.mxu0 %v372_v8 }
  0x25   : > { %238 = vmatprep.subr.bf16.mxu0 %v388_v1 }
  0x28   : > { %239 = vmatpush1.bf16.msra.mxu0 %v373_v9 }
  0x29   : > { %240 = vmatprep.subr.bf16.mxu0 %v388_v1 }
  0x2c   : > { %241 = vmatpush1.bf16.msra.mxu0 %v374_v10 }
  0x2d   : > { %256 = vmatprep.subr.bf16.mxu0 %v388_v1 }
  0x30   : > { %257 = vmatpush2.bf16.msra.mxu0 %v375_v11 }
  0x33   : > { %259 = vmatmul.mubr.bf16.vlgmr.msra.gmra.mxu0 %v343_v12 }
  0xf3   : > { %v260_v13 = vpop.f32.mrf.mxu0 }
  0xf4   : > { %v267_v14 = vsel %vm266_vm1, %v260_v13, 0.0 }
  0xf5   : > { %268 = vadd.xlane.f32.xlu0 %v267_v14  ;;  %v262_v15 = vpop.f32.mrf.mxu0 }
  0xf7   : > { %v263_v16 = vpop.f32.mrf.mxu0 }
  0xf9   : > { %v264_v17 = vpop.f32.mrf.mxu0 }
 0x17e   : > { %v269_v18 = vpop.xlane.xlu0 %268 }
 0x17f   : > { %v271_v19 = vmul.f32 0.008264462, %v269_v18 }
 0x181   : > { %v272_v20 = vsub.f32 %v260_v13, %v271_v19 }
 0x183   : > { %v273_v21 = vmul.f32 %v272_v20, %v272_v20 }
 0x185   : > { %v274_v22 = vsel %vm266_vm1, %v273_v21, 0.0 }
 0x186   : > { %275 = vadd.xlane.f32.xlu0 %v274_v22 }
 0x20f   : > { %v276_v23 = vpop.xlane.xlu0 %275 }
 0x210   : > { %v277_v24 = vmul.f32 0.008264462, %v276_v23 }
 0x212   : > { %v278_v25 = vadd.f32 1e-05, %v277_v24 }
 0x214   : > { %378 = vrsqrt.f32 %v278_v25 }
 0x221   : > { %v379_v26 = vpop.eup %378 }
 0x222   : > { %v280_v27 = vmul.f32 %v379_v26, %v272_v20 }
 0x224   : > { %v281_v28 = vmax.f32 %v280_v27, 0.0 }
 0x226   : > { %282 = vst.msk [vmem:[%s141_s20] sm:$0xff] %vm266_vm1, %v281_v28 }
 0x227 PF: > { %s12_s9 = sadd.s32 1, %s386_s9  }
 0x228   : > { %p9_p4 = scmp.ge.s32.totalorder %s12_s9, 4  }
 0x22a   :  { %11 = sbr.rel (!%p9_p4) target bundleno = 1 (0x1), region = 58 }

// kernel: generator_forward.27
= control target key start
LH: loop header
LB: loop body
LE: loop exit
PB: predicated region body
PF: predicated region fallthrough
CT: control target
= control target key end

     0   :  { %s672_s9 = smov 0   ;;  %s739_s0 = inlined_call_operand.vmem [shape: bf16[2,288,256], index: 0, kind: input, shape index: {}]   ;;  %s740_s1 = inlined_call_operand.vmem [shape: bf16[3,288], index: 1, kind: input, shape index: {}]   ;;  %s741_s2 = inlined_call_operand.vmem [shape: f32[2,3,256], index: 2, kind: output, shape index: {}]  }
   0x1 LB: > { %s529_s10 = sadd.s32 4294967295, %s653_s9   ;;  %p533_p0 = scmp.ge.s32.totalorder %s653_s9, 1  ;;  %s653_s9 = sphi %s672_s9, %s12_s9  }
   0x2   : > { %p112_p1 = scmp.lt.s32.totalorder %s653_s9, 3 }
   0x4   : > { %p113_p2 = pnand %p533_p0, %p112_p1 }
   0x5   : > { %p134_p3 = scmp.lt.s32.totalorder (!%p113_p2), %s529_s10, 1 }
   0x6   : > { %116 = sbr.rel (%p113_p2) target bundleno = 294 (0x126), region = 28 }
   0xb   : > { %v187_v0 = vlaneseq  ;;  %v655_v1 = vmov 0   ;;  %v656_v2 = vmov 1983009808   ;;  %s743_s10 = smov (!%p134_p3, %s529_s10), 1  ;;  %v145_v7 = vld [vmem:[%s740_s1] sm:$0x3f] }
   0xc   : > { %458 = vmatprep.mubr.bf16.mxu1 %v655_v1  ;;  %v185_v3 = vunpack.c.l.s4 %v656_v2  ;;  %s577_s11 = smul.u32 288, %s743_s10  ;;  %v183_v26 = vcombine.high %v145_v7, %v145_v7  ;;  %vm381_vm0 = vcmask 261120   ;;  %s576_s17 = sshll.u32 %s743_s10, 3 }
   0xd   : > { %v188_v4 = vshrl.u32 %v187_v0, 7  ;;  %s143_s20 = scalar_lea.vmem %s741_s2, %s576_s17 }
   0xe   : > { %v186_v5 = vunpack.c.0.s8 %v185_v3  ;;  %s686_s14 = scalar_lea.vmem %s739_s0, %s577_s11 }
   0xf   : > { %v588_v8 = vld [vmem:[%s686_s14 + $0x74] ss:$8 sps:$4 sm:$0xff]   ;;  %v590_v10 = vld [vmem:[%s686_s14 + $0x70] ss:$8 sps:$4 sm:$0xff]   ;;  %v591_v11 = vld [vmem:[%s686_s14 + $0x64] ss:$8 sps:$4 sm:$0xff]  }
  0x10   : > { %v189_v6 = vsub.s32 %v186_v5, %v188_v4  ;;  %385 = vmatprep.subr.bf16.mxu0 %v588_v8  ;;  %v593_v13 = vld [vmem:[%s686_s14 + $0x60] ss:$8 sps:$4 sm:$0xff]   ;;  %v594_v14 = vld [vmem:[%s686_s14 + $0x54] ss:$8 sps:$4 sm:$0xff]   ;;  %v596_v15 = vld [vmem:[%s686_s14 + $0x50] ss:$8 sps:$4 sm:$0xff]  }
  0x11   : > { %386 = vmatpush1.bf16.msra.mxu0 %v590_v10  ;;  %v597_v16 = vld [vmem:[%s686_s14 + $0x44] ss:$8 sps:$4 sm:$0xff]   ;;  %v599_v17 = vld [vmem:[%s686_s14 + $0x40] ss:$8 sps:$4 sm:$0xff]   ;;  %v600_v18 = vld [vmem:[%s686_s14 + $0x34] ss:$8 sps:$4 sm:$0xff]  }
  0x12   : > { %v692_v9 = vrot.slane %v145_v7, %v189_v6  ;;  %387 = vmatprep.subr.bf16.mxu0 %v591_v11  ;;  %v602_v19 = vld [vmem:[%s686_s14 + $0x30] ss:$8 sps:$4 sm:$0xff]   ;;  %v603_v20 = vld [vmem:[%s686_s14 + $0x24] ss:$8 sps:$4 sm:$0xff]   ;;  %v627_v21 = vld [vmem:[%s686_s14 + $0x114] ss:$8 sps:$4 sm:$0xff]   ;;  %v197_v30 = vrot.slane %v183_v26, %v189_v6 }
  0x13   : > { %v629_v22 = vld [vmem:[%s686_s14 + $0x110] ss:$8 sps:$4 sm:$0xff]   ;;  %v605_v23 = vld [vmem:[%s686_s14 + $0x20] ss:$8 sps:$4 sm:$0xff]   ;;  %v606_v24 = vld [vmem:[%s686_s14 + $0x14] ss:$8 sps:$4 sm:$0xff]   ;;  %438 = vmatprep.subr.bf16.mxu1 %v627_v21 }
  0x14   : > { %v198_v12 = vcombine.high %v692_v9, %v692_v9  ;;  %v633_v25 = vld [vmem:[%s686_s14 + $0x104] ss:$8 sps:$4 sm:$0xff]   ;;  %439 = vmatpush1.bf16.msra.mxu1 %v629_v22  ;;  %v635_v27 = vld [vmem:[%s686_s14 + $0x100] ss:$8 sps:$4 sm:$0xff]   ;;  %v608_v28 = vld [vmem:[%s686_s14 + $0x10] ss:$8 sps:$4 sm:$0xff]  }
  0x15   : > { %388 = vmatpush1.bf16.msra.mxu0 %v593_v13  ;;  %440 = vmatprep.subr.bf16.mxu1 %v633_v25  ;;  %v609_v29 = vld [vmem:[%s686_s14 + $0x4] ss:$8 sps:$4 sm:$0xff]   ;;  %v611_v31 = vld [vmem:[%s686_s14] ss:$8 sps:$4 sm:$0xff]   ;;  %v612_v32 = vld [vmem:[%s686_s14 + $0xf4] ss:$8 sps:$4 sm:$0xff]  }
  0x16   : > { %417 = vmatprep.mubr.bf16.mxu0 %v198_v12  ;;  %389 = vmatprep.subr.bf16.mxu0 %v594_v14  ;;  %v614_v33 = vld [vmem:[%s686_s14 + $0xf0] ss:$8 sps:$4 sm:$0xff]   ;;  %v615_v34 = vld [vmem:[%s686_s14 + $0xe4] ss:$8 sps:$4 sm:$0xff]   ;;  %v617_v35 = vld [vmem:[%s686_s14 + $0xe0] ss:$8 sps:$4 sm:$0xff]  }
  0x17   : > { %v618_v36 = vld [vmem:[%s686_s14 + $0xd4] ss:$8 sps:$4 sm:$0xff]   ;;  %v620_v37 = vld [vmem:[%s686_s14 + $0xd0] ss:$8 sps:$4 sm:$0xff]   ;;  %v621_v38 = vld [vmem:[%s686_s14 + $0xc4] ss:$8 sps:$4 sm:$0xff]  }
  0x18   : > { %441 = vmatpush1.bf16.msra.mxu1 %v635_v27  ;;  %v623_v39 = vld [vmem:[%s686_s14 + $0xc0] ss:$8 sps:$4 sm:$0xff]   ;;  %v624_v40 = vld [vmem:[%s686_s14 + $0xb4] ss:$8 sps:$4 sm:$0xff]   ;;  %v626_v41 = vld [vmem:[%s686_s14 + $0xb0] ss:$8 sps:$4 sm:$0xff]  }
  0x19   : > { %390 = vmatpush1.bf16.msra.mxu0 %v596_v15  ;;  %v630_v42 = vld [vmem:[%s686_s14 + $0xa4] ss:$8 sps:$4 sm:$0xff]   ;;  %v632_v43 = vld [vmem:[%s686_s14 + $0xa0] ss:$8 sps:$4 sm:$0xff]   ;;  %v636_v44 = vld [vmem:[%s686_s14 + $0x94] ss:$8 sps:$4 sm:$0xff]  }
  0x1a   : > { %391 = vmatprep.subr.bf16.mxu0 %v597_v16  ;;  %v638_v45 = vld [vmem:[%s686_s14 + $0x90] ss:$8 sps:$4 sm:$0xff]   ;;  %v640_v46 = vld [vmem:[%s686_s14 + $0x84] ss:$8 sps:$4 sm:$0xff]   ;;  %v642_v47 = vld [vmem:[%s686_s14 + $0x80] ss:$8 sps:$4 sm:$0xff]  }
  0x1b   : > { %573 = vmatmul.mubr.msk.bf16.vlgmr.msra.gmra.mxu1 %vm381_vm0, %v197_v30 }
  0x1d   : > { %392 = vmatpush1.bf16.msra.mxu0 %v599_v17 }
  0x1e   : > { %393 = vmatprep.subr.bf16.mxu0 %v600_v18 }
  0x21   : > { %394 = vmatpush1.bf16.msra.mxu0 %v602_v19 }
  0x22   : > { %395 = vmatprep.subr.bf16.mxu0 %v603_v20 }
  0x25   : > { %396 = vmatpush1.bf16.msra.mxu0 %v605_v23 }
  0x26   : > { %397 = vmatprep.subr.bf16.mxu0 %v606_v24 }
  0x29   : > { %398 = vmatpush1.bf16.msra.mxu0 %v608_v28 }
  0x2a   : > { %399 = vmatprep.subr.bf16.mxu0 %v609_v29 }
  0x2d   : > { %400 = vmatpush1.bf16.msra.mxu0 %v611_v31 }
  0x2e   : > { %401 = vmatprep.subr.bf16.mxu0 %v612_v32 }
  0x31   : > { %402 = vmatpush2.bf16.msra.mxu0 %v614_v33 }
  0x32   : > { %403 = vmatprep.subr.bf16.mxu0 %v615_v34 }
  0x35   : > { %404 = vmatpush2.bf16.msra.mxu0 %v617_v35 }
  0x36   : > { %405 = vmatprep.subr.bf16.mxu0 %v618_v36 }
  0x39   : > { %406 = vmatpush2.bf16.msra.mxu0 %v620_v37 }
  0x3a   : > { %407 = vmatprep.subr.bf16.mxu0 %v621_v38 }
  0x3d   : > { %408 = vmatpush2.bf16.msra.mxu0 %v623_v39 }
  0x3e   : > { %409 = vmatprep.subr.bf16.mxu0 %v624_v40 }
  0x41   : > { %410 = vmatpush2.bf16.msra.mxu0 %v626_v41 }
  0x42   : > { %411 = vmatprep.subr.bf16.mxu0 %v630_v42 }
  0x45   : > { %412 = vmatpush2.bf16.msra.mxu0 %v632_v43 }
  0x46   : > { %413 = vmatprep.subr.bf16.mxu0 %v636_v44 }
  0x49   : > { %414 = vmatpush2.bf16.msra.mxu0 %v638_v45 }
  0x4a   : > { %415 = vmatprep.subr.bf16.mxu0 %v640_v46 }
  0x4d   : > { %416 = vmatpush2.bf16.msra.mxu0 %v642_v47 }
  0x50   : > { %418 = vmatmul.mubr.bf16.vlgmr.msra.gmra.mxu0 %v692_v9 }
  0xdb   : > { %v460_v48 = vpop.f32.mrf.mxu1 }
  0xdd   : > { %v462_v49 = vpop.f32.mrf.mxu1 }
  0xdf   : > { %v464_v50 = vpop.f32.mrf.mxu1 }
  0xe1   : > { %v465_v51 = vpop.f32.mrf.mxu1 }
 0x110   : > { %v419_v52 = vpop.f32.mrf.mxu0 }
 0x111   : > { %v461_v53 = vadd.f32 %v460_v48, %v419_v52 }
 0x112   : > { %v421_v54 = vpop.f32.mrf.mxu0 }
 0x113   : > { %v463_v55 = vadd.f32 %v462_v49, %v421_v54  ;;  %643 = vtanh.f32 %v461_v53 }
 0x114   : > { %v423_v56 = vpop.f32.mrf.mxu0 }
 0x115   : > { %645 = vtanh.f32 %v463_v55 }
 0x116   : > { %v424_v57 = vpop.f32.mrf.mxu0 }
 0x120   : > { %v644_v58 = vpop.eup %643 }
 0x122   : > { %v646_v59 = vpop.eup %645 }
 0x123   : > { %v471_v60 = vcombine.low %v644_v58, %v646_v59 }
 0x125   : > { %473 = vst [vmem:[%s143_s20] sm:$0x77] %v471_v60 }
 0x126 PF: > { %s12_s9 = sadd.s32 1, %s653_s9  }
 0x127   : > { %p9_p4 = scmp.ge.s32.totalorder %s12_s9, 4  }
 0x129   :  { %11 = sbr.rel (!%p9_p4) target bundleno = 1 (0x1), region = 58 }

</bundles_post_ra>
